<compile_context>
chip_gen: v5e
topology: v5e:2x2
jax: 0.10.0
libtpu: 0.0.40
codegen_flags: <defaults>
</compile_context>

<pallas_src>
import math
import jax
import jax.numpy as jnp
from jax.experimental import pallas as pl
from jax.experimental.pallas import tpu as pltpu  # noqa: F401  (not needed at this size)

# ----------------------------- small ALBERT config -----------------------------
VOCAB = 100
TYPE_VOCAB = 2
MAX_POS = 64
EMB = 32            # embedding_size
HID = 64            # hidden_size
N_HEADS = 4
HEAD_DIM = HID // N_HEADS
INTER = 128         # intermediate_size
N_LAYERS = 2        # ALBERT shares one layer's params across all layers
LN_EPS = 1e-12

_GELU_C = 0.7978845608028654      # sqrt(2/pi)
_ATTN_SCALE = 1.0 / math.sqrt(HEAD_DIM)

# packed bias / LayerNorm vector slab: one row per vector, padded to 3*HID lanes
_SLAB_W = 3 * HID
(R_EMB_G, R_EMB_B, R_MAP_B, R_QKV_B, R_AO_B, R_ALN_G, R_ALN_B,
 R_FFN_B, R_FO_B, R_LN2_G, R_LN2_B) = range(11)
N_SLAB_ROWS = 11

# packed hidden-side weight matrix: columns = [ qkv (192) | attn_out (64) | ffn_in (128) ]
_QKV_OFF = 0
_AO_OFF = 3 * HID
_FFN_OFF = 4 * HID
_WHID_COLS = 4 * HID + INTER      # 384


# ------------------------------ in-kernel helpers -------------------------------
def _ln(x, g, b):
    # variance as E[x^2] - mu^2: the two cross-lane reductions are independent
    mu = jnp.mean(x, axis=-1, keepdims=True)
    var = jnp.mean(x * x, axis=-1, keepdims=True) - mu * mu
    return (x - mu) * jax.lax.rsqrt(var + LN_EPS) * g + b


def _gelu_new(h):
    # ALBERT uses the tanh ("gelu_new") approximation
    return 0.5 * h * (1.0 + jnp.tanh(_GELU_C * (h + 0.044715 * h * h * h)))


# --------------------------- fused encoder kernel -------------------------------
def _fused_encoder_kernel(emb_ref, bias_ref, vec_ref, w_hid_ref, map_w_ref, fo_w_ref, o_ref):
    f32 = jnp.float32
    bf16 = jnp.bfloat16

    vec = vec_ref[...]                                        # (11, 192) f32 bias/LN slab

    def row(i, width):
        return vec[i:i + 1, :width]

    emb_g, emb_b = row(R_EMB_G, EMB), row(R_EMB_B, EMB)
    map_b = row(R_MAP_B, HID)
    qkv_b = row(R_QKV_B, 3 * HID)
    ao_b = row(R_AO_B, HID)
    aln_g, aln_b = row(R_ALN_G, HID), row(R_ALN_B, HID)
    ffn_b = row(R_FFN_B, INTER)
    fo_b = row(R_FO_B, HID)
    ln2_g, ln2_b = row(R_LN2_G, HID), row(R_LN2_B, HID)

    w_hid = w_hid_ref[...]                                    # (HID, 384) bf16 packed weights
    qkv_w = w_hid[:, _QKV_OFF:_QKV_OFF + 3 * HID]             # (HID, 192), attn scale pre-folded in Q
    ao_w = w_hid[:, _AO_OFF:_AO_OFF + HID]                    # (HID, HID)
    ffn_w = w_hid[:, _FFN_OFF:_FFN_OFF + INTER]               # (HID, INTER)
    map_w = map_w_ref[...]                                    # (EMB, HID)  bf16
    fo_w = fo_w_ref[...]                                      # (INTER, HID) bf16

    bias = bias_ref[...]                                      # (T, T) joint additive attention mask

    # embedding LayerNorm + embedding->hidden projection, all T tokens at once
    x = _ln(emb_ref[...], emb_g, emb_b)                       # (T, EMB) f32
    h = jnp.dot(x.astype(bf16), map_w, preferred_element_type=f32) + map_b   # (T, HID)

    for _ in range(N_LAYERS):       # ALBERT: identical parameters reused every layer
        # fused QKV projection: (T, HID) @ (HID, 3*HID) -> (T, 3*HID)
        qkv = jnp.dot(h.astype(bf16), qkv_w, preferred_element_type=f32) + qkv_b
        qkv16 = qkv.astype(bf16)

        ctx_parts = []
        for hd in range(N_HEADS):
            c = hd * HEAD_DIM
            q = qkv16[:, c:c + HEAD_DIM]                              # (T, dH)
            k = qkv16[:, HID + c:HID + c + HEAD_DIM]                  # (T, dH)
            v = qkv16[:, 2 * HID + c:2 * HID + c + HEAD_DIM]          # (T, dH)

            # q @ k^T via dot_general contracting last dims (no explicit transpose);
            # scale is already folded into the Q weights.
            s = jax.lax.dot_general(q, k, (((1,), (1,)), ((), ())),
                                    preferred_element_type=f32)       # (T, T)
            s = s + bias
            s = s - jnp.max(s, axis=-1, keepdims=True)
            p = jnp.exp(s)
            p = p * pl.reciprocal(jnp.sum(p, axis=-1, keepdims=True), approx=True)
            ctx_parts.append(jnp.dot(p.astype(bf16), v, preferred_element_type=f32))  # (T, dH)

        # one lane-concat, then a single 64-deep output projection
        ctx = jnp.concatenate(ctx_parts, axis=1)                      # (T, HID)
        proj = jnp.dot(ctx.astype(bf16), ao_w, preferred_element_type=f32) + ao_b
        attn_out = _ln(proj + h, aln_g, aln_b)

        # FFN: bias + GELU + second matmul + residual LayerNorm, all in VMEM/vregs
        ffn = jnp.dot(attn_out.astype(bf16), ffn_w, preferred_element_type=f32) + ffn_b
        ffn = _gelu_new(ffn)
        ffn_out = jnp.dot(ffn.astype(bf16), fo_w, preferred_element_type=f32) + fo_b
        h = _ln(ffn_out + attn_out, ln2_g, ln2_b)

    o_ref[...] = h


# ------------------------------ model (forward) ----------------------------------
def init_params(key):
    def nrm(k, shape):
        return 0.02 * jax.random.normal(k, shape, dtype=jnp.float32)

    ks = jax.random.split(key, 12)
    q_w = nrm(ks[0], (HID, HID)) * _ATTN_SCALE      # attention scale folded into Q weights (host-side)
    k_w = nrm(ks[1], (HID, HID))
    v_w = nrm(ks[2], (HID, HID))
    qkv_w = jnp.concatenate([q_w, k_w, v_w], axis=1)            # (HID, 3*HID)
    ao_w = nrm(ks[3], (HID, HID))
    ffn_w = nrm(ks[4], (HID, INTER))
    fo_w = nrm(ks[5], (INTER, HID))
    map_w = nrm(ks[6], (EMB, HID))

    def srow(v):
        v = v.reshape(1, -1)
        return jnp.pad(v, ((0, 0), (0, _SLAB_W - v.shape[1])))

    # all bias / LayerNorm vectors packed once into a single (11, 192) f32 slab
    vec_slab = jnp.concatenate([
        srow(jnp.ones((EMB,), jnp.float32)),        # R_EMB_G   emb LayerNorm gamma
        srow(jnp.zeros((EMB,), jnp.float32)),       # R_EMB_B   emb LayerNorm beta
        srow(jnp.zeros((HID,), jnp.float32)),       # R_MAP_B   emb->hidden bias
        srow(jnp.zeros((3 * HID,), jnp.float32)),   # R_QKV_B   fused QKV bias (Q part would be pre-scaled)
        srow(jnp.zeros((HID,), jnp.float32)),       # R_AO_B    attn out bias
        srow(jnp.ones((HID,), jnp.float32)),        # R_ALN_G   attn LayerNorm gamma
        srow(jnp.zeros((HID,), jnp.float32)),       # R_ALN_B   attn LayerNorm beta
        srow(jnp.zeros((INTER,), jnp.float32)),     # R_FFN_B   ffn bias
        srow(jnp.zeros((HID,), jnp.float32)),       # R_FO_B    ffn out bias
        srow(jnp.ones((HID,), jnp.float32)),        # R_LN2_G   ffn LayerNorm gamma
        srow(jnp.zeros((HID,), jnp.float32)),       # R_LN2_B   ffn LayerNorm beta
    ], axis=0)

    return {
        # embeddings (gathered in plain JAX)
        "word_emb": nrm(ks[7], (VOCAB, EMB)),
        "pos_emb": nrm(ks[8], (MAX_POS, EMB)),
        "tok_emb": nrm(ks[9], (TYPE_VOCAB, EMB)),
        # packed kernel inputs
        "vec_slab": vec_slab,                                                   # (11, 192) f32
        "w_hid": jnp.concatenate([qkv_w, ao_w, ffn_w], axis=1).astype(jnp.bfloat16),  # (HID, 384) bf16
        "map_w": map_w.astype(jnp.bfloat16),                                    # (EMB, HID) bf16
        "fo_w": fo_w.astype(jnp.bfloat16),                                      # (INTER, HID) bf16
        # PointerSummarizer: self.init parameter (uniform_ init in the reference)
        "init": jax.random.uniform(ks[10], (HID,), jnp.float32),
    }


def albert_forward(params, x, segs, mask):
    """Mirrors Albert.forward: returns last_hidden_state (B, S, HID)."""
    B, S = x.shape
    T = B * S

    # TODO(synk): embedding-table gathers stay in plain JAX (data-dependent gather).
    word = jnp.take(params["word_emb"], x, axis=0)                     # (B,S,E)
    pos = jnp.take(params["pos_emb"], jnp.arange(S), axis=0)[None]     # (1,S,E)
    tok = jnp.take(params["tok_emb"], segs, axis=0)                    # (B,S,E)
    emb = (word + pos + tok).reshape(T, EMB)                           # tokens flattened to T rows

    # joint (T, T) additive attention mask: 0 where same-batch AND key unpadded,
    # else -10000 (cross-batch entries underflow to exactly 0 weight after softmax,
    # so this is numerically identical to per-batch attention with the reference mask).
    key_ok = mask.astype(jnp.float32)                                  # (B, S)
    same_b = jnp.eye(B, dtype=jnp.float32)                             # (B, B)
    allow = same_b[:, None, :, None] * key_ok[None, None, :, :]        # (B, 1, B, S)
    allow = jnp.broadcast_to(allow, (B, S, B, S)).reshape(T, T)
    attn_bias = (1.0 - allow) * -10000.0

    out = pl.pallas_call(
        _fused_encoder_kernel,
        out_shape=jax.ShapeDtypeStruct((T, HID), jnp.float32),
        # no grid: single invocation, everything resident in VMEM (tiny shapes).
        # TODO(synk): at real ALBERT sizes (S=512, HID=768) sequence/weight tiling +
        # pl.Buffered(1) weight specs would be needed to fit v7x's 64 MiB VMEM.
    )(emb, attn_bias, params["vec_slab"], params["w_hid"], params["map_w"], params["fo_w"])
    return out.reshape(B, S, HID)


def pointer_summarizer_forward(params, x, segs, clss, mask, mask_cls):
    """PointerSummarizer.forward (train branch, out_cls empty) up to the decoder call."""
    top_vec = albert_forward(params, x, segs, mask)                    # (B, S, HID)
    B = x.shape[0]
    sents_vec = top_vec[jnp.arange(B)[:, None], clss]                  # (B, n_cls, HID)
    sents_vec = sents_vec * mask_cls[:, :, None].astype(jnp.float32)
    init_i = jnp.broadcast_to(params["init"][None, None, :], (B, 1, HID))
    output = init_i                                                    # out_cls.size(1) == 0 branch
    # TODO(synk): TransformerInterDecoder (sent_scores head) is not defined in the provided
    # spec, so the decoder scoring step is not implemented here.
    return top_vec, sents_vec, output


# ----------------------------------- main ----------------------------------------
if __name__ == "__main__":
    key = jax.random.PRNGKey(0)
    pkey, xkey = jax.random.split(key)
    params = init_params(pkey)

    B, S = 2, 8
    x = jax.random.randint(xkey, (B, S), 0, VOCAB, dtype=jnp.int32)
    segs = jnp.concatenate(
        [jnp.zeros((B, S // 2), jnp.int32), jnp.ones((B, S // 2), jnp.int32)], axis=1
    )
    mask = jnp.ones((B, S), jnp.float32).at[:, -2:].set(0.0)   # last 2 tokens padded
    clss = jnp.array([[0, 4], [0, 4]], dtype=jnp.int32)        # CLS positions
    mask_cls = jnp.ones((B, 2), jnp.float32)

    fwd = jax.jit(pointer_summarizer_forward)
    top_vec, sents_vec, output = fwd(params, x, segs, clss, mask, mask_cls)
    jax.block_until_ready((top_vec, sents_vec, output))

    assert top_vec.shape == (B, S, HID) and top_vec.dtype == jnp.float32
    assert sents_vec.shape == (B, 2, HID)
    assert output.shape == (B, 1, HID)
    assert bool(jnp.all(jnp.isfinite(top_vec)))
    assert bool(jnp.all(jnp.isfinite(sents_vec)))
    print("KERNEL_OK")
</pallas_src>

<mosaic_0001>
module attributes {stable_mosaic.version = 11 : i64} {
  func.func @_fused_encoder_kernel(%arg0: memref<16x32xf32, #tpu.memory_space<vmem>>, %arg1: memref<16x16xf32, #tpu.memory_space<vmem>>, %arg2: memref<11x192xf32, #tpu.memory_space<vmem>>, %arg3: memref<64x384xbf16, #tpu.memory_space<vmem>>, %arg4: memref<32x64xbf16, #tpu.memory_space<vmem>>, %arg5: memref<128x64xbf16, #tpu.memory_space<vmem>>, %arg6: memref<16x64xf32, #tpu.memory_space<vmem>>) attributes {dimension_semantics = [], scalar_prefetch = 0 : i64, scratch_operands = 0 : i64, tpu.core_type = #tpu.core_type<tc>} {
    %c0 = arith.constant 0 : index
    %c0_0 = arith.constant 0 : index
    %0 = vector.load %arg2[%c0, %c0_0] : memref<11x192xf32, #tpu.memory_space<vmem>>, vector<11x192xf32>
    %1 = vector.extract_strided_slice %0 {offsets = [0, 0], sizes = [1, 32], strides = [1, 1]} : vector<11x192xf32> to vector<1x32xf32>
    %2 = vector.extract_strided_slice %0 {offsets = [1, 0], sizes = [1, 32], strides = [1, 1]} : vector<11x192xf32> to vector<1x32xf32>
    %3 = vector.extract_strided_slice %0 {offsets = [2, 0], sizes = [1, 64], strides = [1, 1]} : vector<11x192xf32> to vector<1x64xf32>
    %4 = vector.extract_strided_slice %0 {offsets = [3, 0], sizes = [1, 192], strides = [1, 1]} : vector<11x192xf32> to vector<1x192xf32>
    %5 = vector.extract_strided_slice %0 {offsets = [4, 0], sizes = [1, 64], strides = [1, 1]} : vector<11x192xf32> to vector<1x64xf32>
    %6 = vector.extract_strided_slice %0 {offsets = [5, 0], sizes = [1, 64], strides = [1, 1]} : vector<11x192xf32> to vector<1x64xf32>
    %7 = vector.extract_strided_slice %0 {offsets = [6, 0], sizes = [1, 64], strides = [1, 1]} : vector<11x192xf32> to vector<1x64xf32>
    %8 = vector.extract_strided_slice %0 {offsets = [7, 0], sizes = [1, 128], strides = [1, 1]} : vector<11x192xf32> to vector<1x128xf32>
    %9 = vector.extract_strided_slice %0 {offsets = [8, 0], sizes = [1, 64], strides = [1, 1]} : vector<11x192xf32> to vector<1x64xf32>
    %10 = vector.extract_strided_slice %0 {offsets = [9, 0], sizes = [1, 64], strides = [1, 1]} : vector<11x192xf32> to vector<1x64xf32>
    %11 = vector.extract_strided_slice %0 {offsets = [10, 0], sizes = [1, 64], strides = [1, 1]} : vector<11x192xf32> to vector<1x64xf32>
    %c0_1 = arith.constant 0 : index
    %c0_2 = arith.constant 0 : index
    %12 = vector.load %arg3[%c0_1, %c0_2] : memref<64x384xbf16, #tpu.memory_space<vmem>>, vector<64x384xbf16>
    %13 = vector.extract_strided_slice %12 {offsets = [0, 0], sizes = [64, 192], strides = [1, 1]} : vector<64x384xbf16> to vector<64x192xbf16>
    %14 = vector.extract_strided_slice %12 {offsets = [0, 192], sizes = [64, 64], strides = [1, 1]} : vector<64x384xbf16> to vector<64x64xbf16>
    %15 = vector.extract_strided_slice %12 {offsets = [0, 256], sizes = [64, 128], strides = [1, 1]} : vector<64x384xbf16> to vector<64x128xbf16>
    %c0_3 = arith.constant 0 : index
    %c0_4 = arith.constant 0 : index
    %16 = vector.load %arg4[%c0_3, %c0_4] : memref<32x64xbf16, #tpu.memory_space<vmem>>, vector<32x64xbf16>
    %c0_5 = arith.constant 0 : index
    %c0_6 = arith.constant 0 : index
    %17 = vector.load %arg5[%c0_5, %c0_6] : memref<128x64xbf16, #tpu.memory_space<vmem>>, vector<128x64xbf16>
    %c0_7 = arith.constant 0 : index
    %c0_8 = arith.constant 0 : index
    %18 = vector.load %arg1[%c0_7, %c0_8] : memref<16x16xf32, #tpu.memory_space<vmem>>, vector<16x16xf32>
    %c0_9 = arith.constant 0 : index
    %c0_10 = arith.constant 0 : index
    %19 = vector.load %arg0[%c0_9, %c0_10] : memref<16x32xf32, #tpu.memory_space<vmem>>, vector<16x32xf32>
    %cst = arith.constant dense<0.000000e+00> : vector<16xf32>
    %20 = vector.multi_reduction <add>, %19, %cst [1] : vector<16x32xf32> to vector<16xf32>
    %21 = vector.shape_cast %20 : vector<16xf32> to vector<16x1xf32>
    %cst_11 = arith.constant 3.200000e+01 : f32
    %22 = vector.broadcast %cst_11 : f32 to vector<16x1xf32>
    %23 = arith.divf %21, %22 : vector<16x1xf32>
    %24 = arith.mulf %19, %19 : vector<16x32xf32>
    %cst_12 = arith.constant dense<0.000000e+00> : vector<16xf32>
    %25 = vector.multi_reduction <add>, %24, %cst_12 [1] : vector<16x32xf32> to vector<16xf32>
    %26 = vector.shape_cast %25 : vector<16xf32> to vector<16x1xf32>
    %cst_13 = arith.constant 3.200000e+01 : f32
    %27 = vector.broadcast %cst_13 : f32 to vector<16x1xf32>
    %28 = arith.divf %26, %27 : vector<16x1xf32>
    %29 = arith.mulf %23, %23 : vector<16x1xf32>
    %30 = arith.subf %28, %29 : vector<16x1xf32>
    %31 = vector.broadcast %23 : vector<16x1xf32> to vector<16x32xf32>
    %32 = arith.subf %19, %31 : vector<16x32xf32>
    %cst_14 = arith.constant 9.99999996E-13 : f32
    %33 = vector.broadcast %cst_14 : f32 to vector<16x1xf32>
    %34 = arith.addf %30, %33 : vector<16x1xf32>
    %35 = math.rsqrt %34 : vector<16x1xf32>
    %36 = vector.broadcast %35 : vector<16x1xf32> to vector<16x32xf32>
    %37 = arith.mulf %32, %36 : vector<16x32xf32>
    %38 = vector.broadcast %1 : vector<1x32xf32> to vector<16x32xf32>
    %39 = arith.mulf %37, %38 : vector<16x32xf32>
    %40 = vector.broadcast %2 : vector<1x32xf32> to vector<16x32xf32>
    %41 = arith.addf %39, %40 : vector<16x32xf32>
    %42 = arith.truncf %41 : vector<16x32xf32> to vector<16x32xbf16>
    %cst_15 = arith.constant dense<0.000000e+00> : vector<16x64xf32>
    %43 = tpu.matmul %42, %16, %cst_15 {dimension_numbers = #tpu.dot_dimension_numbers<[1], [0], [0], [1], [0, 0, 1, 1], [], []>} : vector<16x32xbf16>, vector<32x64xbf16>, vector<16x64xf32> -> vector<16x64xf32>
    %44 = vector.broadcast %3 : vector<1x64xf32> to vector<16x64xf32>
    %45 = arith.addf %43, %44 : vector<16x64xf32>
    %46 = arith.truncf %45 : vector<16x64xf32> to vector<16x64xbf16>
    %cst_16 = arith.constant dense<0.000000e+00> : vector<16x192xf32>
    %47 = tpu.matmul %46, %13, %cst_16 {dimension_numbers = #tpu.dot_dimension_numbers<[1], [0], [0], [1], [0, 0, 1, 1], [], []>} : vector<16x64xbf16>, vector<64x192xbf16>, vector<16x192xf32> -> vector<16x192xf32>
    %48 = vector.broadcast %4 : vector<1x192xf32> to vector<16x192xf32>
    %49 = arith.addf %47, %48 : vector<16x192xf32>
    %50 = arith.truncf %49 : vector<16x192xf32> to vector<16x192xbf16>
    %51 = vector.extract_strided_slice %50 {offsets = [0, 0], sizes = [16, 16], strides = [1, 1]} : vector<16x192xbf16> to vector<16x16xbf16>
    %52 = vector.extract_strided_slice %50 {offsets = [0, 64], sizes = [16, 16], strides = [1, 1]} : vector<16x192xbf16> to vector<16x16xbf16>
    %53 = vector.extract_strided_slice %50 {offsets = [0, 128], sizes = [16, 16], strides = [1, 1]} : vector<16x192xbf16> to vector<16x16xbf16>
    %cst_17 = arith.constant dense<0.000000e+00> : vector<16x16xf32>
    %54 = tpu.matmul %51, %52, %cst_17 {dimension_numbers = #tpu.dot_dimension_numbers<[1], [1], [0], [0], [0, 0, 1, 0], [], []>} : vector<16x16xbf16>, vector<16x16xbf16>, vector<16x16xf32> -> vector<16x16xf32>
    %55 = arith.addf %54, %18 : vector<16x16xf32>
    %cst_18 = arith.constant dense<0xFF800000> : vector<16xf32>
    %56 = vector.multi_reduction <maximumf>, %55, %cst_18 [1] : vector<16x16xf32> to vector<16xf32>
    %57 = vector.shape_cast %56 : vector<16xf32> to vector<16x1xf32>
    %58 = vector.broadcast %57 : vector<16x1xf32> to vector<16x16xf32>
    %59 = arith.subf %55, %58 : vector<16x16xf32>
    %60 = math.exp %59 : vector<16x16xf32>
    %cst_19 = arith.constant dense<0.000000e+00> : vector<16xf32>
    %61 = vector.multi_reduction <add>, %60, %cst_19 [1] : vector<16x16xf32> to vector<16xf32>
    %62 = vector.shape_cast %61 : vector<16xf32> to vector<16x1xf32>
    %63 = tpu.reciprocal %62 {approx = true} : vector<16x1xf32> -> vector<16x1xf32>
    %64 = vector.broadcast %63 : vector<16x1xf32> to vector<16x16xf32>
    %65 = arith.mulf %60, %64 : vector<16x16xf32>
    %66 = arith.truncf %65 : vector<16x16xf32> to vector<16x16xbf16>
    %cst_20 = arith.constant dense<0.000000e+00> : vector<16x16xf32>
    %67 = tpu.matmul %66, %53, %cst_20 {dimension_numbers = #tpu.dot_dimension_numbers<[1], [0], [0], [1], [0, 0, 1, 1], [], []>} : vector<16x16xbf16>, vector<16x16xbf16>, vector<16x16xf32> -> vector<16x16xf32>
    %68 = vector.extract_strided_slice %50 {offsets = [0, 16], sizes = [16, 16], strides = [1, 1]} : vector<16x192xbf16> to vector<16x16xbf16>
    %69 = vector.extract_strided_slice %50 {offsets = [0, 80], sizes = [16, 16], strides = [1, 1]} : vector<16x192xbf16> to vector<16x16xbf16>
    %70 = vector.extract_strided_slice %50 {offsets = [0, 144], sizes = [16, 16], strides = [1, 1]} : vector<16x192xbf16> to vector<16x16xbf16>
    %cst_21 = arith.constant dense<0.000000e+00> : vector<16x16xf32>
    %71 = tpu.matmul %68, %69, %cst_21 {dimension_numbers = #tpu.dot_dimension_numbers<[1], [1], [0], [0], [0, 0, 1, 0], [], []>} : vector<16x16xbf16>, vector<16x16xbf16>, vector<16x16xf32> -> vector<16x16xf32>
    %72 = arith.addf %71, %18 : vector<16x16xf32>
    %cst_22 = arith.constant dense<0xFF800000> : vector<16xf32>
    %73 = vector.multi_reduction <maximumf>, %72, %cst_22 [1] : vector<16x16xf32> to vector<16xf32>
    %74 = vector.shape_cast %73 : vector<16xf32> to vector<16x1xf32>
    %75 = vector.broadcast %74 : vector<16x1xf32> to vector<16x16xf32>
    %76 = arith.subf %72, %75 : vector<16x16xf32>
    %77 = math.exp %76 : vector<16x16xf32>
    %cst_23 = arith.constant dense<0.000000e+00> : vector<16xf32>
    %78 = vector.multi_reduction <add>, %77, %cst_23 [1] : vector<16x16xf32> to vector<16xf32>
    %79 = vector.shape_cast %78 : vector<16xf32> to vector<16x1xf32>
    %80 = tpu.reciprocal %79 {approx = true} : vector<16x1xf32> -> vector<16x1xf32>
    %81 = vector.broadcast %80 : vector<16x1xf32> to vector<16x16xf32>
    %82 = arith.mulf %77, %81 : vector<16x16xf32>
    %83 = arith.truncf %82 : vector<16x16xf32> to vector<16x16xbf16>
    %cst_24 = arith.constant dense<0.000000e+00> : vector<16x16xf32>
    %84 = tpu.matmul %83, %70, %cst_24 {dimension_numbers = #tpu.dot_dimension_numbers<[1], [0], [0], [1], [0, 0, 1, 1], [], []>} : vector<16x16xbf16>, vector<16x16xbf16>, vector<16x16xf32> -> vector<16x16xf32>
    %85 = vector.extract_strided_slice %50 {offsets = [0, 32], sizes = [16, 16], strides = [1, 1]} : vector<16x192xbf16> to vector<16x16xbf16>
    %86 = vector.extract_strided_slice %50 {offsets = [0, 96], sizes = [16, 16], strides = [1, 1]} : vector<16x192xbf16> to vector<16x16xbf16>
    %87 = vector.extract_strided_slice %50 {offsets = [0, 160], sizes = [16, 16], strides = [1, 1]} : vector<16x192xbf16> to vector<16x16xbf16>
    %cst_25 = arith.constant dense<0.000000e+00> : vector<16x16xf32>
    %88 = tpu.matmul %85, %86, %cst_25 {dimension_numbers = #tpu.dot_dimension_numbers<[1], [1], [0], [0], [0, 0, 1, 0], [], []>} : vector<16x16xbf16>, vector<16x16xbf16>, vector<16x16xf32> -> vector<16x16xf32>
    %89 = arith.addf %88, %18 : vector<16x16xf32>
    %cst_26 = arith.constant dense<0xFF800000> : vector<16xf32>
    %90 = vector.multi_reduction <maximumf>, %89, %cst_26 [1] : vector<16x16xf32> to vector<16xf32>
    %91 = vector.shape_cast %90 : vector<16xf32> to vector<16x1xf32>
    %92 = vector.broadcast %91 : vector<16x1xf32> to vector<16x16xf32>
    %93 = arith.subf %89, %92 : vector<16x16xf32>
    %94 = math.exp %93 : vector<16x16xf32>
    %cst_27 = arith.constant dense<0.000000e+00> : vector<16xf32>
    %95 = vector.multi_reduction <add>, %94, %cst_27 [1] : vector<16x16xf32> to vector<16xf32>
    %96 = vector.shape_cast %95 : vector<16xf32> to vector<16x1xf32>
    %97 = tpu.reciprocal %96 {approx = true} : vector<16x1xf32> -> vector<16x1xf32>
    %98 = vector.broadcast %97 : vector<16x1xf32> to vector<16x16xf32>
    %99 = arith.mulf %94, %98 : vector<16x16xf32>
    %100 = arith.truncf %99 : vector<16x16xf32> to vector<16x16xbf16>
    %cst_28 = arith.constant dense<0.000000e+00> : vector<16x16xf32>
    %101 = tpu.matmul %100, %87, %cst_28 {dimension_numbers = #tpu.dot_dimension_numbers<[1], [0], [0], [1], [0, 0, 1, 1], [], []>} : vector<16x16xbf16>, vector<16x16xbf16>, vector<16x16xf32> -> vector<16x16xf32>
    %102 = vector.extract_strided_slice %50 {offsets = [0, 48], sizes = [16, 16], strides = [1, 1]} : vector<16x192xbf16> to vector<16x16xbf16>
    %103 = vector.extract_strided_slice %50 {offsets = [0, 112], sizes = [16, 16], strides = [1, 1]} : vector<16x192xbf16> to vector<16x16xbf16>
    %104 = vector.extract_strided_slice %50 {offsets = [0, 176], sizes = [16, 16], strides = [1, 1]} : vector<16x192xbf16> to vector<16x16xbf16>
    %cst_29 = arith.constant dense<0.000000e+00> : vector<16x16xf32>
    %105 = tpu.matmul %102, %103, %cst_29 {dimension_numbers = #tpu.dot_dimension_numbers<[1], [1], [0], [0], [0, 0, 1, 0], [], []>} : vector<16x16xbf16>, vector<16x16xbf16>, vector<16x16xf32> -> vector<16x16xf32>
    %106 = arith.addf %105, %18 : vector<16x16xf32>
    %cst_30 = arith.constant dense<0xFF800000> : vector<16xf32>
    %107 = vector.multi_reduction <maximumf>, %106, %cst_30 [1] : vector<16x16xf32> to vector<16xf32>
    %108 = vector.shape_cast %107 : vector<16xf32> to vector<16x1xf32>
    %109 = vector.broadcast %108 : vector<16x1xf32> to vector<16x16xf32>
    %110 = arith.subf %106, %109 : vector<16x16xf32>
    %111 = math.exp %110 : vector<16x16xf32>
    %cst_31 = arith.constant dense<0.000000e+00> : vector<16xf32>
    %112 = vector.multi_reduction <add>, %111, %cst_31 [1] : vector<16x16xf32> to vector<16xf32>
    %113 = vector.shape_cast %112 : vector<16xf32> to vector<16x1xf32>
    %114 = tpu.reciprocal %113 {approx = true} : vector<16x1xf32> -> vector<16x1xf32>
    %115 = vector.broadcast %114 : vector<16x1xf32> to vector<16x16xf32>
    %116 = arith.mulf %111, %115 : vector<16x16xf32>
    %117 = arith.truncf %116 : vector<16x16xf32> to vector<16x16xbf16>
    %cst_32 = arith.constant dense<0.000000e+00> : vector<16x16xf32>
    %118 = tpu.matmul %117, %104, %cst_32 {dimension_numbers = #tpu.dot_dimension_numbers<[1], [0], [0], [1], [0, 0, 1, 1], [], []>} : vector<16x16xbf16>, vector<16x16xbf16>, vector<16x16xf32> -> vector<16x16xf32>
    %119 = tpu.concatenate %67, %84, %101, %118 in 1 : vector<16x16xf32>, vector<16x16xf32>, vector<16x16xf32>, vector<16x16xf32> -> vector<16x64xf32>
    %120 = arith.truncf %119 : vector<16x64xf32> to vector<16x64xbf16>
    %cst_33 = arith.constant dense<0.000000e+00> : vector<16x64xf32>
    %121 = tpu.matmul %120, %14, %cst_33 {dimension_numbers = #tpu.dot_dimension_numbers<[1], [0], [0], [1], [0, 0, 1, 1], [], []>} : vector<16x64xbf16>, vector<64x64xbf16>, vector<16x64xf32> -> vector<16x64xf32>
    %122 = vector.broadcast %5 : vector<1x64xf32> to vector<16x64xf32>
    %123 = arith.addf %121, %122 : vector<16x64xf32>
    %124 = arith.addf %123, %45 : vector<16x64xf32>
    %cst_34 = arith.constant dense<0.000000e+00> : vector<16xf32>
    %125 = vector.multi_reduction <add>, %124, %cst_34 [1] : vector<16x64xf32> to vector<16xf32>
    %126 = vector.shape_cast %125 : vector<16xf32> to vector<16x1xf32>
    %cst_35 = arith.constant 6.400000e+01 : f32
    %127 = vector.broadcast %cst_35 : f32 to vector<16x1xf32>
    %128 = arith.divf %126, %127 : vector<16x1xf32>
    %129 = arith.mulf %124, %124 : vector<16x64xf32>
    %cst_36 = arith.constant dense<0.000000e+00> : vector<16xf32>
    %130 = vector.multi_reduction <add>, %129, %cst_36 [1] : vector<16x64xf32> to vector<16xf32>
    %131 = vector.shape_cast %130 : vector<16xf32> to vector<16x1xf32>
    %cst_37 = arith.constant 6.400000e+01 : f32
    %132 = vector.broadcast %cst_37 : f32 to vector<16x1xf32>
    %133 = arith.divf %131, %132 : vector<16x1xf32>
    %134 = arith.mulf %128, %128 : vector<16x1xf32>
    %135 = arith.subf %133, %134 : vector<16x1xf32>
    %136 = vector.broadcast %128 : vector<16x1xf32> to vector<16x64xf32>
    %137 = arith.subf %124, %136 : vector<16x64xf32>
    %cst_38 = arith.constant 9.99999996E-13 : f32
    %138 = vector.broadcast %cst_38 : f32 to vector<16x1xf32>
    %139 = arith.addf %135, %138 : vector<16x1xf32>
    %140 = math.rsqrt %139 : vector<16x1xf32>
    %141 = vector.broadcast %140 : vector<16x1xf32> to vector<16x64xf32>
    %142 = arith.mulf %137, %141 : vector<16x64xf32>
    %143 = vector.broadcast %6 : vector<1x64xf32> to vector<16x64xf32>
    %144 = arith.mulf %142, %143 : vector<16x64xf32>
    %145 = vector.broadcast %7 : vector<1x64xf32> to vector<16x64xf32>
    %146 = arith.addf %144, %145 : vector<16x64xf32>
    %147 = arith.truncf %146 : vector<16x64xf32> to vector<16x64xbf16>
    %cst_39 = arith.constant dense<0.000000e+00> : vector<16x128xf32>
    %148 = tpu.matmul %147, %15, %cst_39 {dimension_numbers = #tpu.dot_dimension_numbers<[1], [0], [0], [1], [0, 0, 1, 1], [], []>} : vector<16x64xbf16>, vector<64x128xbf16>, vector<16x128xf32> -> vector<16x128xf32>
    %149 = vector.broadcast %8 : vector<1x128xf32> to vector<16x128xf32>
    %150 = arith.addf %148, %149 : vector<16x128xf32>
    %cst_40 = arith.constant 5.000000e-01 : f32
    %151 = vector.broadcast %cst_40 : f32 to vector<16x128xf32>
    %152 = arith.mulf %151, %150 : vector<16x128xf32>
    %cst_41 = arith.constant 4.471500e-02 : f32
    %153 = vector.broadcast %cst_41 : f32 to vector<16x128xf32>
    %154 = arith.mulf %153, %150 : vector<16x128xf32>
    %155 = arith.mulf %154, %150 : vector<16x128xf32>
    %156 = arith.mulf %155, %150 : vector<16x128xf32>
    %157 = arith.addf %150, %156 : vector<16x128xf32>
    %cst_42 = arith.constant 0.797884583 : f32
    %158 = vector.broadcast %cst_42 : f32 to vector<16x128xf32>
    %159 = arith.mulf %158, %157 : vector<16x128xf32>
    %160 = math.tanh %159 : vector<16x128xf32>
    %cst_43 = arith.constant 1.000000e+00 : f32
    %161 = vector.broadcast %cst_43 : f32 to vector<16x128xf32>
    %162 = arith.addf %161, %160 : vector<16x128xf32>
    %163 = arith.mulf %152, %162 : vector<16x128xf32>
    %164 = arith.truncf %163 : vector<16x128xf32> to vector<16x128xbf16>
    %cst_44 = arith.constant dense<0.000000e+00> : vector<16x64xf32>
    %165 = tpu.matmul %164, %17, %cst_44 {dimension_numbers = #tpu.dot_dimension_numbers<[1], [0], [0], [1], [0, 0, 1, 1], [], []>} : vector<16x128xbf16>, vector<128x64xbf16>, vector<16x64xf32> -> vector<16x64xf32>
    %166 = vector.broadcast %9 : vector<1x64xf32> to vector<16x64xf32>
    %167 = arith.addf %165, %166 : vector<16x64xf32>
    %168 = arith.addf %167, %146 : vector<16x64xf32>
    %cst_45 = arith.constant dense<0.000000e+00> : vector<16xf32>
    %169 = vector.multi_reduction <add>, %168, %cst_45 [1] : vector<16x64xf32> to vector<16xf32>
    %170 = vector.shape_cast %169 : vector<16xf32> to vector<16x1xf32>
    %cst_46 = arith.constant 6.400000e+01 : f32
    %171 = vector.broadcast %cst_46 : f32 to vector<16x1xf32>
    %172 = arith.divf %170, %171 : vector<16x1xf32>
    %173 = arith.mulf %168, %168 : vector<16x64xf32>
    %cst_47 = arith.constant dense<0.000000e+00> : vector<16xf32>
    %174 = vector.multi_reduction <add>, %173, %cst_47 [1] : vector<16x64xf32> to vector<16xf32>
    %175 = vector.shape_cast %174 : vector<16xf32> to vector<16x1xf32>
    %cst_48 = arith.constant 6.400000e+01 : f32
    %176 = vector.broadcast %cst_48 : f32 to vector<16x1xf32>
    %177 = arith.divf %175, %176 : vector<16x1xf32>
    %178 = arith.mulf %172, %172 : vector<16x1xf32>
    %179 = arith.subf %177, %178 : vector<16x1xf32>
    %180 = vector.broadcast %172 : vector<16x1xf32> to vector<16x64xf32>
    %181 = arith.subf %168, %180 : vector<16x64xf32>
    %cst_49 = arith.constant 9.99999996E-13 : f32
    %182 = vector.broadcast %cst_49 : f32 to vector<16x1xf32>
    %183 = arith.addf %179, %182 : vector<16x1xf32>
    %184 = math.rsqrt %183 : vector<16x1xf32>
    %185 = vector.broadcast %184 : vector<16x1xf32> to vector<16x64xf32>
    %186 = arith.mulf %181, %185 : vector<16x64xf32>
    %187 = vector.broadcast %10 : vector<1x64xf32> to vector<16x64xf32>
    %188 = arith.mulf %186, %187 : vector<16x64xf32>
    %189 = vector.broadcast %11 : vector<1x64xf32> to vector<16x64xf32>
    %190 = arith.addf %188, %189 : vector<16x64xf32>
    %191 = arith.truncf %190 : vector<16x64xf32> to vector<16x64xbf16>
    %cst_50 = arith.constant dense<0.000000e+00> : vector<16x192xf32>
    %192 = tpu.matmul %191, %13, %cst_50 {dimension_numbers = #tpu.dot_dimension_numbers<[1], [0], [0], [1], [0, 0, 1, 1], [], []>} : vector<16x64xbf16>, vector<64x192xbf16>, vector<16x192xf32> -> vector<16x192xf32>
    %193 = vector.broadcast %4 : vector<1x192xf32> to vector<16x192xf32>
    %194 = arith.addf %192, %193 : vector<16x192xf32>
    %195 = arith.truncf %194 : vector<16x192xf32> to vector<16x192xbf16>
    %196 = vector.extract_strided_slice %195 {offsets = [0, 0], sizes = [16, 16], strides = [1, 1]} : vector<16x192xbf16> to vector<16x16xbf16>
    %197 = vector.extract_strided_slice %195 {offsets = [0, 64], sizes = [16, 16], strides = [1, 1]} : vector<16x192xbf16> to vector<16x16xbf16>
    %198 = vector.extract_strided_slice %195 {offsets = [0, 128], sizes = [16, 16], strides = [1, 1]} : vector<16x192xbf16> to vector<16x16xbf16>
    %cst_51 = arith.constant dense<0.000000e+00> : vector<16x16xf32>
    %199 = tpu.matmul %196, %197, %cst_51 {dimension_numbers = #tpu.dot_dimension_numbers<[1], [1], [0], [0], [0, 0, 1, 0], [], []>} : vector<16x16xbf16>, vector<16x16xbf16>, vector<16x16xf32> -> vector<16x16xf32>
    %200 = arith.addf %199, %18 : vector<16x16xf32>
    %cst_52 = arith.constant dense<0xFF800000> : vector<16xf32>
    %201 = vector.multi_reduction <maximumf>, %200, %cst_52 [1] : vector<16x16xf32> to vector<16xf32>
    %202 = vector.shape_cast %201 : vector<16xf32> to vector<16x1xf32>
    %203 = vector.broadcast %202 : vector<16x1xf32> to vector<16x16xf32>
    %204 = arith.subf %200, %203 : vector<16x16xf32>
    %205 = math.exp %204 : vector<16x16xf32>
    %cst_53 = arith.constant dense<0.000000e+00> : vector<16xf32>
    %206 = vector.multi_reduction <add>, %205, %cst_53 [1] : vector<16x16xf32> to vector<16xf32>
    %207 = vector.shape_cast %206 : vector<16xf32> to vector<16x1xf32>
    %208 = tpu.reciprocal %207 {approx = true} : vector<16x1xf32> -> vector<16x1xf32>
    %209 = vector.broadcast %208 : vector<16x1xf32> to vector<16x16xf32>
    %210 = arith.mulf %205, %209 : vector<16x16xf32>
    %211 = arith.truncf %210 : vector<16x16xf32> to vector<16x16xbf16>
    %cst_54 = arith.constant dense<0.000000e+00> : vector<16x16xf32>
    %212 = tpu.matmul %211, %198, %cst_54 {dimension_numbers = #tpu.dot_dimension_numbers<[1], [0], [0], [1], [0, 0, 1, 1], [], []>} : vector<16x16xbf16>, vector<16x16xbf16>, vector<16x16xf32> -> vector<16x16xf32>
    %213 = vector.extract_strided_slice %195 {offsets = [0, 16], sizes = [16, 16], strides = [1, 1]} : vector<16x192xbf16> to vector<16x16xbf16>
    %214 = vector.extract_strided_slice %195 {offsets = [0, 80], sizes = [16, 16], strides = [1, 1]} : vector<16x192xbf16> to vector<16x16xbf16>
    %215 = vector.extract_strided_slice %195 {offsets = [0, 144], sizes = [16, 16], strides = [1, 1]} : vector<16x192xbf16> to vector<16x16xbf16>
    %cst_55 = arith.constant dense<0.000000e+00> : vector<16x16xf32>
    %216 = tpu.matmul %213, %214, %cst_55 {dimension_numbers = #tpu.dot_dimension_numbers<[1], [1], [0], [0], [0, 0, 1, 0], [], []>} : vector<16x16xbf16>, vector<16x16xbf16>, vector<16x16xf32> -> vector<16x16xf32>
    %217 = arith.addf %216, %18 : vector<16x16xf32>
    %cst_56 = arith.constant dense<0xFF800000> : vector<16xf32>
    %218 = vector.multi_reduction <maximumf>, %217, %cst_56 [1] : vector<16x16xf32> to vector<16xf32>
    %219 = vector.shape_cast %218 : vector<16xf32> to vector<16x1xf32>
    %220 = vector.broadcast %219 : vector<16x1xf32> to vector<16x16xf32>
    %221 = arith.subf %217, %220 : vector<16x16xf32>
    %222 = math.exp %221 : vector<16x16xf32>
    %cst_57 = arith.constant dense<0.000000e+00> : vector<16xf32>
    %223 = vector.multi_reduction <add>, %222, %cst_57 [1] : vector<16x16xf32> to vector<16xf32>
    %224 = vector.shape_cast %223 : vector<16xf32> to vector<16x1xf32>
    %225 = tpu.reciprocal %224 {approx = true} : vector<16x1xf32> -> vector<16x1xf32>
    %226 = vector.broadcast %225 : vector<16x1xf32> to vector<16x16xf32>
    %227 = arith.mulf %222, %226 : vector<16x16xf32>
    %228 = arith.truncf %227 : vector<16x16xf32> to vector<16x16xbf16>
    %cst_58 = arith.constant dense<0.000000e+00> : vector<16x16xf32>
    %229 = tpu.matmul %228, %215, %cst_58 {dimension_numbers = #tpu.dot_dimension_numbers<[1], [0], [0], [1], [0, 0, 1, 1], [], []>} : vector<16x16xbf16>, vector<16x16xbf16>, vector<16x16xf32> -> vector<16x16xf32>
    %230 = vector.extract_strided_slice %195 {offsets = [0, 32], sizes = [16, 16], strides = [1, 1]} : vector<16x192xbf16> to vector<16x16xbf16>
    %231 = vector.extract_strided_slice %195 {offsets = [0, 96], sizes = [16, 16], strides = [1, 1]} : vector<16x192xbf16> to vector<16x16xbf16>
    %232 = vector.extract_strided_slice %195 {offsets = [0, 160], sizes = [16, 16], strides = [1, 1]} : vector<16x192xbf16> to vector<16x16xbf16>
    %cst_59 = arith.constant dense<0.000000e+00> : vector<16x16xf32>
    %233 = tpu.matmul %230, %231, %cst_59 {dimension_numbers = #tpu.dot_dimension_numbers<[1], [1], [0], [0], [0, 0, 1, 0], [], []>} : vector<16x16xbf16>, vector<16x16xbf16>, vector<16x16xf32> -> vector<16x16xf32>
    %234 = arith.addf %233, %18 : vector<16x16xf32>
    %cst_60 = arith.constant dense<0xFF800000> : vector<16xf32>
    %235 = vector.multi_reduction <maximumf>, %234, %cst_60 [1] : vector<16x16xf32> to vector<16xf32>
    %236 = vector.shape_cast %235 : vector<16xf32> to vector<16x1xf32>
    %237 = vector.broadcast %236 : vector<16x1xf32> to vector<16x16xf32>
    %238 = arith.subf %234, %237 : vector<16x16xf32>
    %239 = math.exp %238 : vector<16x16xf32>
    %cst_61 = arith.constant dense<0.000000e+00> : vector<16xf32>
    %240 = vector.multi_reduction <add>, %239, %cst_61 [1] : vector<16x16xf32> to vector<16xf32>
    %241 = vector.shape_cast %240 : vector<16xf32> to vector<16x1xf32>
    %242 = tpu.reciprocal %241 {approx = true} : vector<16x1xf32> -> vector<16x1xf32>
    %243 = vector.broadcast %242 : vector<16x1xf32> to vector<16x16xf32>
    %244 = arith.mulf %239, %243 : vector<16x16xf32>
    %245 = arith.truncf %244 : vector<16x16xf32> to vector<16x16xbf16>
    %cst_62 = arith.constant dense<0.000000e+00> : vector<16x16xf32>
    %246 = tpu.matmul %245, %232, %cst_62 {dimension_numbers = #tpu.dot_dimension_numbers<[1], [0], [0], [1], [0, 0, 1, 1], [], []>} : vector<16x16xbf16>, vector<16x16xbf16>, vector<16x16xf32> -> vector<16x16xf32>
    %247 = vector.extract_strided_slice %195 {offsets = [0, 48], sizes = [16, 16], strides = [1, 1]} : vector<16x192xbf16> to vector<16x16xbf16>
    %248 = vector.extract_strided_slice %195 {offsets = [0, 112], sizes = [16, 16], strides = [1, 1]} : vector<16x192xbf16> to vector<16x16xbf16>
    %249 = vector.extract_strided_slice %195 {offsets = [0, 176], sizes = [16, 16], strides = [1, 1]} : vector<16x192xbf16> to vector<16x16xbf16>
    %cst_63 = arith.constant dense<0.000000e+00> : vector<16x16xf32>
    %250 = tpu.matmul %247, %248, %cst_63 {dimension_numbers = #tpu.dot_dimension_numbers<[1], [1], [0], [0], [0, 0, 1, 0], [], []>} : vector<16x16xbf16>, vector<16x16xbf16>, vector<16x16xf32> -> vector<16x16xf32>
    %251 = arith.addf %250, %18 : vector<16x16xf32>
    %cst_64 = arith.constant dense<0xFF800000> : vector<16xf32>
    %252 = vector.multi_reduction <maximumf>, %251, %cst_64 [1] : vector<16x16xf32> to vector<16xf32>
    %253 = vector.shape_cast %252 : vector<16xf32> to vector<16x1xf32>
    %254 = vector.broadcast %253 : vector<16x1xf32> to vector<16x16xf32>
    %255 = arith.subf %251, %254 : vector<16x16xf32>
    %256 = math.exp %255 : vector<16x16xf32>
    %cst_65 = arith.constant dense<0.000000e+00> : vector<16xf32>
    %257 = vector.multi_reduction <add>, %256, %cst_65 [1] : vector<16x16xf32> to vector<16xf32>
    %258 = vector.shape_cast %257 : vector<16xf32> to vector<16x1xf32>
    %259 = tpu.reciprocal %258 {approx = true} : vector<16x1xf32> -> vector<16x1xf32>
    %260 = vector.broadcast %259 : vector<16x1xf32> to vector<16x16xf32>
    %261 = arith.mulf %256, %260 : vector<16x16xf32>
    %262 = arith.truncf %261 : vector<16x16xf32> to vector<16x16xbf16>
    %cst_66 = arith.constant dense<0.000000e+00> : vector<16x16xf32>
    %263 = tpu.matmul %262, %249, %cst_66 {dimension_numbers = #tpu.dot_dimension_numbers<[1], [0], [0], [1], [0, 0, 1, 1], [], []>} : vector<16x16xbf16>, vector<16x16xbf16>, vector<16x16xf32> -> vector<16x16xf32>
    %264 = tpu.concatenate %212, %229, %246, %263 in 1 : vector<16x16xf32>, vector<16x16xf32>, vector<16x16xf32>, vector<16x16xf32> -> vector<16x64xf32>
    %265 = arith.truncf %264 : vector<16x64xf32> to vector<16x64xbf16>
    %cst_67 = arith.constant dense<0.000000e+00> : vector<16x64xf32>
    %266 = tpu.matmul %265, %14, %cst_67 {dimension_numbers = #tpu.dot_dimension_numbers<[1], [0], [0], [1], [0, 0, 1, 1], [], []>} : vector<16x64xbf16>, vector<64x64xbf16>, vector<16x64xf32> -> vector<16x64xf32>
    %267 = vector.broadcast %5 : vector<1x64xf32> to vector<16x64xf32>
    %268 = arith.addf %266, %267 : vector<16x64xf32>
    %269 = arith.addf %268, %190 : vector<16x64xf32>
    %cst_68 = arith.constant dense<0.000000e+00> : vector<16xf32>
    %270 = vector.multi_reduction <add>, %269, %cst_68 [1] : vector<16x64xf32> to vector<16xf32>
    %271 = vector.shape_cast %270 : vector<16xf32> to vector<16x1xf32>
    %cst_69 = arith.constant 6.400000e+01 : f32
    %272 = vector.broadcast %cst_69 : f32 to vector<16x1xf32>
    %273 = arith.divf %271, %272 : vector<16x1xf32>
    %274 = arith.mulf %269, %269 : vector<16x64xf32>
    %cst_70 = arith.constant dense<0.000000e+00> : vector<16xf32>
    %275 = vector.multi_reduction <add>, %274, %cst_70 [1] : vector<16x64xf32> to vector<16xf32>
    %276 = vector.shape_cast %275 : vector<16xf32> to vector<16x1xf32>
    %cst_71 = arith.constant 6.400000e+01 : f32
    %277 = vector.broadcast %cst_71 : f32 to vector<16x1xf32>
    %278 = arith.divf %276, %277 : vector<16x1xf32>
    %279 = arith.mulf %273, %273 : vector<16x1xf32>
    %280 = arith.subf %278, %279 : vector<16x1xf32>
    %281 = vector.broadcast %273 : vector<16x1xf32> to vector<16x64xf32>
    %282 = arith.subf %269, %281 : vector<16x64xf32>
    %cst_72 = arith.constant 9.99999996E-13 : f32
    %283 = vector.broadcast %cst_72 : f32 to vector<16x1xf32>
    %284 = arith.addf %280, %283 : vector<16x1xf32>
    %285 = math.rsqrt %284 : vector<16x1xf32>
    %286 = vector.broadcast %285 : vector<16x1xf32> to vector<16x64xf32>
    %287 = arith.mulf %282, %286 : vector<16x64xf32>
    %288 = vector.broadcast %6 : vector<1x64xf32> to vector<16x64xf32>
    %289 = arith.mulf %287, %288 : vector<16x64xf32>
    %290 = vector.broadcast %7 : vector<1x64xf32> to vector<16x64xf32>
    %291 = arith.addf %289, %290 : vector<16x64xf32>
    %292 = arith.truncf %291 : vector<16x64xf32> to vector<16x64xbf16>
    %cst_73 = arith.constant dense<0.000000e+00> : vector<16x128xf32>
    %293 = tpu.matmul %292, %15, %cst_73 {dimension_numbers = #tpu.dot_dimension_numbers<[1], [0], [0], [1], [0, 0, 1, 1], [], []>} : vector<16x64xbf16>, vector<64x128xbf16>, vector<16x128xf32> -> vector<16x128xf32>
    %294 = vector.broadcast %8 : vector<1x128xf32> to vector<16x128xf32>
    %295 = arith.addf %293, %294 : vector<16x128xf32>
    %cst_74 = arith.constant 5.000000e-01 : f32
    %296 = vector.broadcast %cst_74 : f32 to vector<16x128xf32>
    %297 = arith.mulf %296, %295 : vector<16x128xf32>
    %cst_75 = arith.constant 4.471500e-02 : f32
    %298 = vector.broadcast %cst_75 : f32 to vector<16x128xf32>
    %299 = arith.mulf %298, %295 : vector<16x128xf32>
    %300 = arith.mulf %299, %295 : vector<16x128xf32>
    %301 = arith.mulf %300, %295 : vector<16x128xf32>
    %302 = arith.addf %295, %301 : vector<16x128xf32>
    %cst_76 = arith.constant 0.797884583 : f32
    %303 = vector.broadcast %cst_76 : f32 to vector<16x128xf32>
    %304 = arith.mulf %303, %302 : vector<16x128xf32>
    %305 = math.tanh %304 : vector<16x128xf32>
    %cst_77 = arith.constant 1.000000e+00 : f32
    %306 = vector.broadcast %cst_77 : f32 to vector<16x128xf32>
    %307 = arith.addf %306, %305 : vector<16x128xf32>
    %308 = arith.mulf %297, %307 : vector<16x128xf32>
    %309 = arith.truncf %308 : vector<16x128xf32> to vector<16x128xbf16>
    %cst_78 = arith.constant dense<0.000000e+00> : vector<16x64xf32>
    %310 = tpu.matmul %309, %17, %cst_78 {dimension_numbers = #tpu.dot_dimension_numbers<[1], [0], [0], [1], [0, 0, 1, 1], [], []>} : vector<16x128xbf16>, vector<128x64xbf16>, vector<16x64xf32> -> vector<16x64xf32>
    %311 = vector.broadcast %9 : vector<1x64xf32> to vector<16x64xf32>
    %312 = arith.addf %310, %311 : vector<16x64xf32>
    %313 = arith.addf %312, %291 : vector<16x64xf32>
    %cst_79 = arith.constant dense<0.000000e+00> : vector<16xf32>
    %314 = vector.multi_reduction <add>, %313, %cst_79 [1] : vector<16x64xf32> to vector<16xf32>
    %315 = vector.shape_cast %314 : vector<16xf32> to vector<16x1xf32>
    %cst_80 = arith.constant 6.400000e+01 : f32
    %316 = vector.broadcast %cst_80 : f32 to vector<16x1xf32>
    %317 = arith.divf %315, %316 : vector<16x1xf32>
    %318 = arith.mulf %313, %313 : vector<16x64xf32>
    %cst_81 = arith.constant dense<0.000000e+00> : vector<16xf32>
    %319 = vector.multi_reduction <add>, %318, %cst_81 [1] : vector<16x64xf32> to vector<16xf32>
    %320 = vector.shape_cast %319 : vector<16xf32> to vector<16x1xf32>
    %cst_82 = arith.constant 6.400000e+01 : f32
    %321 = vector.broadcast %cst_82 : f32 to vector<16x1xf32>
    %322 = arith.divf %320, %321 : vector<16x1xf32>
    %323 = arith.mulf %317, %317 : vector<16x1xf32>
    %324 = arith.subf %322, %323 : vector<16x1xf32>
    %325 = vector.broadcast %317 : vector<16x1xf32> to vector<16x64xf32>
    %326 = arith.subf %313, %325 : vector<16x64xf32>
    %cst_83 = arith.constant 9.99999996E-13 : f32
    %327 = vector.broadcast %cst_83 : f32 to vector<16x1xf32>
    %328 = arith.addf %324, %327 : vector<16x1xf32>
    %329 = math.rsqrt %328 : vector<16x1xf32>
    %330 = vector.broadcast %329 : vector<16x1xf32> to vector<16x64xf32>
    %331 = arith.mulf %326, %330 : vector<16x64xf32>
    %332 = vector.broadcast %10 : vector<1x64xf32> to vector<16x64xf32>
    %333 = arith.mulf %331, %332 : vector<16x64xf32>
    %334 = vector.broadcast %11 : vector<1x64xf32> to vector<16x64xf32>
    %335 = arith.addf %333, %334 : vector<16x64xf32>
    %c0_84 = arith.constant 0 : index
    %c0_85 = arith.constant 0 : index
    %336 = vector.load %arg6[%c0_84, %c0_85] : memref<16x64xf32, #tpu.memory_space<vmem>>, vector<16x64xf32>
    tpu.vector_store %arg6[%c0_84, %c0_85], %335 {strides = array<i32>} : memref<16x64xf32, #tpu.memory_space<vmem>>, vector<16x64xf32>,
    return
  }
}

</mosaic_0001>

<bundles_post_ra>
// kernel: pointer_summarizer_forward.1
= control target key start
LH: loop header
LB: loop body
LE: loop exit
PB: predicated region body
PF: predicated region fallthrough
CT: control target
= control target key end

     0   :  { %vm67_vm0 = vcmask 261120   ;;  %v1605_v8 = vmov 32.0   ;;  %vm203_vm8 = vcmask 523264   ;;  %s1606_s13 = smov 48   ;;  %s1607_s14 = smov 64   ;;  %vm244_vm9 = vcmask 130048   ;;  %s2171_s0 = inlined_call_operand.vmem [shape: f32[16,32], index: 0, kind: input, shape index: {}]   ;;  %s2172_s4 = inlined_call_operand.vmem [shape: bf16[32,64], index: 4, kind: input, shape index: {}]   ;;  %s2173_s3 = inlined_call_operand.vmem [shape: bf16[64,384], index: 3, kind: input, shape index: {}]   ;;  %s2174_s2 = inlined_call_operand.vmem [shape: f32[11,192], index: 2, kind: input, shape index: {}]   ;;  %s2175_s1 = inlined_call_operand.vmem [shape: f32[16,16], index: 1, kind: input, shape index: {}]   ;;  %s2176_s5 = inlined_call_operand.vmem [shape: bf16[128,64], index: 5, kind: input, shape index: {}]   ;;  %s2177_s6 = inlined_call_operand.vmem [shape: f32[16,64], index: 6, kind: output, shape index: {}]  }
   0x1   :  { %v1652_v0 = vld [vmem:[%s2171_s0] sm:$0xff]  ;;  %v1661_v3 = vld [vmem:[%s2171_s0 + $0x8] sm:$0xff]  ;;  %1509 = vrcp.f32 %v1605_v8  ;;  %v1458_v30 = vld [vmem:[%s2173_s3 + $0x50] sm:$0xf0]  ;;  %s1608_s15 = smov 32   ;;  %s1609_s20 = smov 16  }
   0x2   :  { %v68_v1 = vsel %vm67_vm0, %v1652_v0, 0.0  ;;  %v83_v2 = vmul.f32 %v1652_v0, %v1652_v0  ;;  %v84_v5 = vmul.f32 %v1661_v3, %v1661_v3  ;;  %v71_v6 = vsel %vm67_vm0, %v1661_v3, 0.0  ;;  %v1461_v18 = vld [vmem:[%s2172_s4 + $0x8] sm:$0xff]  ;;  %v1460_v21 = vld [vmem:[%s2172_s4] sm:$0xff]  ;;  %v1372_v33 = vld [vmem:[%s2173_s3 + $0x54] sm:$0xf0] }
   0x3   :  { %69 = vadd.xlane.f32.xlu0 %v68_v1  ;;  %152 = vmatpush.bf16.msra.mxu0 %v1461_v18  ;;  %v1370_v29 = vld [vmem:[%s2173_s3 + $0x48] sm:$0xf]  ;;  %v1457_v31 = vld [vmem:[%s2173_s3 + $0x4c] sm:$0xf]  ;;  %v1696_v48 = vld [vmem:[%s2174_s2] sm:$0xff]  ;;  %s1610_s21 = smov 112  }
   0x4   :  { %v85_v4 = vsel %vm67_vm0, %v83_v2, 0.0  ;;  %v88_v7 = vsel %vm67_vm0, %v84_v5, 0.0  ;;  %v1684_v32 = vor.u32 %v1458_v30, %v1370_v29  ;;  %v1689_v35 = vor.u32 %v1457_v31, %v1372_v33  ;;  %v1362_v63 = vld [vmem:[%s2173_s3 + $0x30] sm:$0xf]  ;;  %v1454_v1 = vld [vmem:[%s2173_s3 + $0x34] sm:$0xf] }
   0x5   :  { %86 = vadd.xlane.f32.xlu1 %v85_v4  ;;  %v123_v52 = vperm.slane %v1696_v48, 0  ;;  %v126_v58 = vperm.slane %v1696_v48, 1  ;;  %v1354_v5 = vld [vmem:[%s2173_s3 + $0x18] sm:$0xf]  ;;  %v130_v18 = vperm.slane %v1696_v48, 2  ;;  %s1612_s22 = smov 96  }
   0x6   :  { %211 = vmatpush.bf16.msra.mxu1 %v1684_v32  ;;  %vm538_vm10 = vcmask 392192  }
   0x7   :  { %v1510_v9 = vpop.eup %1509  ;;  %153 = vmatpush.bf16.msra.mxu0 %v1460_v21 }
   0x8   :  { %v75_v10 = vmul.f32 32.0, %v1510_v9  ;;  %vm79_vm1 = vweird.f32 %v1510_v9 }
   0xa   :  { %v76_v11 = vsub.f32 1.0, %v75_v10 }
   0xb   :  { %72 = vadd.xlane.f32.xlu0 %v71_v6  ;;  %225 = vmatpush.bf16.msrb.mxu0 %v1689_v35  ;;  %v1452_v6 = vld [vmem:[%s2173_s3 + $0x20] sm:$0xf0] }
   0xc   :  { %v77_v12 = vmul.f32 %v1510_v9, %v76_v11  ;;  %v1729_v8 = vor.u32 %v1452_v6, %v1354_v5  ;;  %v1346_v11 = vld [vmem:[%s2173_s3] sm:$0xf] }
   0xd   :  { %89 = vadd.xlane.f32.xlu1 %v88_v7  ;;  %v1451_v7 = vld [vmem:[%s2173_s3 + $0x1c] sm:$0xf] }
   0xe   :  { %v78_v13 = vadd.f32 %v1510_v9, %v77_v12  ;;  %v1449_v12 = vld [vmem:[%s2173_s3 + $0x8] sm:$0xf0] }
  0x10   :  { %v80_v14 = vsel %vm79_vm1, %v1510_v9, %v78_v13  ;;  %v1356_v9 = vld [vmem:[%s2173_s3 + $0x24] sm:$0xf0]  ;;  %v1448_v13 = vld [vmem:[%s2173_s3 + $0x4] sm:$0xf] }
  0x11   :  { %v1735_v10 = vor.u32 %v1451_v7, %v1356_v9 }
  0x76   :  { %v70_v15 = vpop.xlane.xlu0 %69 }
  0x77   :  { %v81_v16 = vmul.f32 %v80_v14, %v70_v15  ;;  %v1348_v15 = vld [vmem:[%s2173_s3 + $0xc] sm:$0xf0] }
  0x78   :  { %v87_v17 = vpop.xlane.xlu1 %86 }
  0x79   :  { %v93_v19 = vmul.f32 %v81_v16, %v81_v16  ;;  %v91_v20 = vmul.f32 %v87_v17, %v80_v14  ;;  %v97_v49 = vsub.f32 %v1652_v0, %v81_v16  ;;  %v1455_v0 = vld [vmem:[%s2173_s3 + $0x38] sm:$0xf0]  ;;  %v1753_v16 = vor.u32 %v1448_v13, %v1348_v15 }
  0x7a   :  { %v1712_v2 = vor.u32 %v1455_v0, %v1362_v63 }
  0x7b   :  { %v95_v22 = vsub.f32 %v91_v20, %v93_v19 }
  0x7c   :  { %212 = vmatpush.bf16.msra.mxu1 %v1712_v2 }
  0x7d   :  { %v99_v23 = vadd.f32 1e-12, %v95_v22 }
  0x7e   :  { %v73_v24 = vpop.xlane.xlu0 %72 }
  0x7f   :  { %1511 = vrsqrt.f32 %v99_v23  ;;  %v82_v25 = vmul.f32 %v80_v14, %v73_v24  ;;  %vm107_vm3 = vweird.f32 %v99_v23 }
  0x80   :  { %v90_v26 = vpop.xlane.xlu1 %89  ;;  %213 = vmatpush.bf16.msra.mxu1 %v1729_v8 }
  0x81   :  { %v94_v27 = vmul.f32 %v82_v25, %v82_v25  ;;  %v92_v28 = vmul.f32 %v90_v26, %v80_v14  ;;  %v98_v54 = vsub.f32 %v1661_v3, %v82_v25  ;;  %v1364_v3 = vld [vmem:[%s2173_s3 + $0x3c] sm:$0xf0]  ;;  %v1748_v14 = vor.u32 %v1449_v12, %v1346_v11 }
  0x82   :  { %v1717_v4 = vor.u32 %v1454_v1, %v1364_v3  ;;  %v1770_v26 = vperm.slane %v1696_v48, 3 }
  0x83   :  { %v96_v34 = vsub.f32 %v92_v28, %v94_v27 }
  0x84   :  { %226 = vmatpush.bf16.msrb.mxu0 %v1717_v4  ;;  %214 = vmatpush.bf16.msra.mxu1 %v1748_v14 }
  0x85   :  { %v1512_v36 = vpop.eup %1511  ;;  %v100_v37 = vadd.f32 1e-12, %v96_v34 }
  0x86   :  { %v102_v38 = vmul.f32 %v1512_v36, %v99_v23  ;;  %vm108_vm2 = vweird.f32 %v1512_v36  ;;  %v25_v23 = vld [vmem:[%s2174_s2 + $0x8] sm:$0xff] }
  0x87   :  { %1513 = vrsqrt.f32 %v100_v37  ;;  %vm109_vm4 = vmor %vm107_vm3, %vm108_vm2  ;;  %vm117_vm6 = vweird.f32 %v100_v37  ;;  %v1772_v27 = vperm.slane %v25_v23, 3 }
  0x88   :  { %v103_v39 = vmul.f32 %v1512_v36, %v102_v38  ;;  %227 = vmatpush.bf16.msrb.mxu0 %v1735_v10 }
  0x8a   :  { %v104_v40 = vmul.f32 0.5, %v103_v39 }
  0x8c   :  { %v105_v41 = vsub.f32 1.5, %v104_v40  ;;  %228 = vmatpush.bf16.msrb.mxu0 %v1753_v16 }
  0x8d   :  { %v1514_v42 = vpop.eup %1513 }
  0x8e   :  { %v106_v43 = vmul.f32 %v1512_v36, %v105_v41  ;;  %v112_v44 = vmul.f32 %v1514_v42, %v100_v37  ;;  %vm118_vm5 = vweird.f32 %v1514_v42 }
  0x8f   :  { %vm119_vm7 = vmor %vm117_vm6, %vm118_vm5 }
  0x90   :  { %v113_v45 = vmul.f32 %v1514_v42, %v112_v44  ;;  %v110_v46 = vsel %vm109_vm4, %v1512_v36, %v106_v43 }
  0x91   :  { %v121_v51 = vmul.f32 %v110_v46, %v97_v49 }
  0x92   :  { %v114_v47 = vmul.f32 0.5, %v113_v45 }
  0x93   :  { %v124_v57 = vmul.f32 %v123_v52, %v121_v51  ;;  %v1791_v51 = vld [vmem:[%s2175_s1] sm:$0xff] }
  0x94   :  { %v115_v50 = vsub.f32 1.5, %v114_v47 }
  0x95   :  { %v127_v60 = vadd.f32 %v126_v58, %v124_v57 }
  0x96   :  { %v116_v53 = vmul.f32 %v1514_v42, %v115_v50 }
  0x98   :  { %v120_v55 = vsel %vm119_vm7, %v1514_v42, %v116_v53 }
  0x99   :  { %v122_v56 = vmul.f32 %v120_v55, %v98_v54  ;;  %v1798_v55 = vld [vmem:[%s2175_s1 + $0x8] sm:$0xff]  ;;  %s1611_s1 = smov 80  }
  0x9b   :  { %v125_v59 = vmul.f32 %v123_v52, %v122_v56 }
  0x9d   :  { %v128_v61 = vadd.f32 %v126_v58, %v125_v59 }
  0x9f   :  { %v129_v62 = vpack.c.bf16 %v128_v61, %v127_v60 }
  0xa1   :  { %1343 = vmatmul.msk.bf16.vlgmr.msra.gmra.mxu0 %vm67_vm0, %v129_v62 }
 0x11e   :  { %v155_v17 = vpop.f32.mrf.mxu0 }
 0x11f   :  { %v1758_v20 = vadd.f32 %v155_v17, %v130_v18 }
 0x126   :  { %v157_v19 = vpop.f32.mrf.mxu0 }
 0x127   :  { %v1760_v21 = vadd.f32 %v157_v19, %v130_v18 }
 0x129   :  { %v160_v22 = vpack.c.bf16 %v1760_v21, %v1758_v20 }
 0x12b   :  { %1376 = vmatmul.msk.bf16.vlgmr.msra.gmra.mxu1 %vm203_vm8, %v160_v22  ;;  %1377 = vmatmul.msk.bf16.vlgmr.msrb.gmra.mxu0 %vm203_vm8, %v160_v22 }
 0x1a8   :  { %v216_v24 = vpop.f32.mrf.mxu1  ;;  %v230_v25 = vpop.f32.mrf.mxu0 }
 0x1a9   :  { %v217_v28 = vadd.f32 %v216_v24, %v1770_v26  ;;  %v231_v29 = vadd.f32 %v230_v25, %v1772_v27 }
 0x1ab   :  { %v235_v33 = vpack.c.bf16 %v231_v29, %v217_v28 }
 0x1ad   :  { %v239_v38 = vunpack.c.l.b16 %v235_v33  ;;  %v288_v39 = vunpack.c.h.b16 %v235_v33 }
 0x1b0   :  { %v218_v30 = vpop.f32.mrf.mxu1  ;;  %v232_v31 = vpop.f32.mrf.mxu0 }
 0x1b1   :  { %v219_v34 = vadd.f32 %v218_v30, %v1770_v26  ;;  %v233_v36 = vadd.f32 %v232_v31, %v1772_v27 }
 0x1b3   :  { %v236_v37 = vpack.c.bf16 %v233_v36, %v219_v34 }
 0x1b5   :  { %v240_v40 = vunpack.c.l.b16 %v236_v37  ;;  %v289_v41 = vunpack.c.h.b16 %v236_v37 }
 0x1b7   :  { %v241_v42 = vpack.c.b16 %v240_v40, %v239_v38  ;;  %v1778_v43 = vpack.c.b16 %v289_v41, %v288_v39 }
 0x1b9   :  { %302 = vmatpush.bf16.msra.mxu2 %v1778_v43  ;;  %311 = vrot.lane.b32.xlu1 %v241_v42, %s1606_s13 }
 0x1ba   :  { %242 = vrot.lane.b32.xlu2 %v241_v42, %s1607_s14 }
 0x1c1   :  { %378 = vrot.lane.b32.xlu1 %v241_v42, %s1608_s15 }
 0x214   :  { %v243_v44 = vpop.permute.xlu2 %242 }
 0x215   :  { %v249_v45 = vsel %vm244_vm9, %v243_v44, 0 }
 0x216   :  { %258 = vmatpush.bf16.xpose.msra.mxu3 %v249_v45 }
 0x21d   :  { %1378 = vmatmul.msk.bf16.vlgmr.msra.gmra.mxu3 %vm244_vm9, %v241_v42 }
 0x22b   :  { %v312_v46 = vpop.permute.xlu1 %311 }
 0x22c   :  { %v317_v47 = vsel %vm244_vm9, %v312_v46, 0 }
 0x22d   :  { %326 = vmatpush.bf16.xpose.msrb.mxu3 %v317_v47 }
 0x233   :  { %v379_v49 = vpop.permute.xlu1 %378 }
 0x234   :  { %v384_v50 = vsel %vm244_vm9, %v379_v49, 0 }
 0x235   :  { %393 = vmatpush.bf16.xpose.msrb.mxu2 %v384_v50 }
 0x2a0   :  { %v260_v52 = vpop.f32.mrf.mxu3 }
 0x2a1   :  { %v261_v53 = vadd.f32 %v260_v52, %v1791_v51 }
 0x2a3   :  { %v265_v54 = vsel %vm244_vm9, %v261_v53, -inf }
 0x2a4   :  { %266 = vmax.xlane.f32.xlu2 %v265_v54 }
 0x2a8   :  { %v262_v56 = vpop.f32.mrf.mxu3 }
 0x2a9   :  { %v263_v57 = vadd.f32 %v262_v56, %v1798_v55 }
 0x2ab   :  { %v268_v58 = vsel %vm244_vm9, %v263_v57, -inf }
 0x2ac   :  { %269 = vmax.xlane.f32.xlu0 %v268_v58 }
 0x2bc   :  { %445 = vrot.lane.b32.xlu2 %v241_v42, %s1609_s20 }
 0x2c0   :  { %309 = vrot.lane.b32.xlu0 %v241_v42, %s1610_s21 }
 0x317   :  { %v267_v59 = vpop.xlane.xlu2 %266 }
 0x318   :  { %v271_v60 = vsub.f32 %v261_v53, %v267_v59 }
 0x31a   :  { %v273_v61 = vmul.f32 1.442695, %v271_v60 }
 0x31c   :  { %1515 = vpow2.f32 %v273_v61 }
 0x31f   :  { %v270_v62 = vpop.xlane.xlu0 %269  ;;  %v446_v63 = vpop.permute.xlu2 %445 }
 0x320   :  { %v272_v0 = vsub.f32 %v263_v57, %v270_v62  ;;  %v451_v1 = vsel %vm244_vm9, %v446_v63, 0 }
 0x321   :  { %460 = vmatpush.bf16.xpose.msra.mxu3 %v451_v1 }
 0x322   :  { %v1516_v3 = vpop.eup %1515  ;;  %v275_v5 = vmul.f32 1.442695, %v272_v0 }
 0x323   :  { %v277_v6 = vsel %vm244_vm9, %v1516_v3, 0.0 }
 0x324   :  { %1517 = vpow2.f32 %v275_v5  ;;  %278 = vadd.xlane.f32.xlu1 %v277_v6 }
 0x32a   :  { %v1518_v7 = vpop.eup %1517 }
 0x32b   :  { %v280_v9 = vsel %vm244_vm9, %v1518_v7, 0.0 }
 0x32c   :  { %281 = vadd.xlane.f32.xlu0 %v280_v9 }
 0x332   :  { %v310_v11 = vpop.permute.xlu0 %309 }
 0x333   :  { %1380 = vmatmul.msk.bf16.vlgmr.msrb.gmra.mxu3 %vm244_vm9, %v310_v11 }
 0x33d   :  { %443 = vrot.lane.b32.xlu1 %v241_v42, %s1611_s1 }
 0x340   :  { %376 = vrot.lane.b32.xlu0 %v241_v42, %s1612_s22 }
 0x397   :  { %v279_v12 = vpop.xlane.xlu1 %278 }
 0x398   :  { %1519 = vrcp.f32 %v279_v12 }
 0x39e   :  { %v1520_v15 = vpop.eup %1519 }
 0x39f   :  { %v282_v13 = vpop.xlane.xlu0 %281  ;;  %v285_v18 = vmul.f32 %v1520_v15, %v1516_v3 }
 0x3a0   :  { %1521 = vrcp.f32 %v282_v13 }
 0x3a6   :  { %v1522_v17 = vpop.eup %1521 }
 0x3a7   :  { %v286_v19 = vmul.f32 %v1522_v17, %v1518_v7 }
 0x3a9   :  { %v287_v22 = vpack.c.bf16 %v286_v19, %v285_v18 }
 0x3ab   :  { %1379 = vmatmul.msk.bf16.vlgmr.msra.gmra.mxu2 %vm244_vm9, %v287_v22 }
 0x3af   :  { %v444_v23 = vpop.permute.xlu1 %443 }
 0x3b0   :  { %1384 = vmatmul.msk.bf16.vlgmr.msra.gmra.mxu3 %vm244_vm9, %v444_v23 }
 0x3b2   :  { %v377_v29 = vpop.permute.xlu0 %376 }
 0x3b6   :  { %v328_v24 = vpop.f32.mrf.mxu3 }
 0x3b7   :  { %v329_v25 = vadd.f32 %v328_v24, %v1791_v51 }
 0x3b9   :  { %v333_v28 = vsel %vm244_vm9, %v329_v25, -inf }
 0x3ba   :  { %334 = vmax.xlane.f32.xlu0 %v333_v28 }
 0x3bb   :  { %1382 = vmatmul.msk.bf16.vlgmr.msrb.gmra.mxu2 %vm244_vm9, %v377_v29 }
 0x3be   :  { %v330_v30 = vpop.f32.mrf.mxu3 }
 0x3bf   :  { %v331_v31 = vadd.f32 %v330_v30, %v1798_v55 }
 0x3c1   :  { %v336_v33 = vsel %vm244_vm9, %v331_v31, -inf }
 0x3c2   :  { %337 = vmax.xlane.f32.xlu1 %v336_v33 }
 0x42d   :  { %v335_v38 = vpop.xlane.xlu0 %334 }
 0x42e   :  { %v1817_v34 = vpop.f32.mrf.mxu2  ;;  %v339_v44 = vsub.f32 %v329_v25, %v335_v38 }
 0x430   :  { %v341_v46 = vmul.f32 1.442695, %v339_v44 }
 0x433   :  { %v462_v36 = vpop.f32.mrf.mxu3 }
 0x434   :  { %v463_v37 = vadd.f32 %v462_v36, %v1791_v51 }
 0x435   :  { %v338_v39 = vpop.xlane.xlu1 %337 }
 0x436   :  { %v340_v40 = vsub.f32 %v331_v31, %v338_v39  ;;  %v1820_v41 = vpop.f32.mrf.mxu2  ;;  %v467_v42 = vsel %vm244_vm9, %v463_v37, -inf }
 0x437   :  { %468 = vmax.xlane.f32.xlu1 %v467_v42 }
 0x438   :  { %v343_v45 = vmul.f32 1.442695, %v340_v40 }
 0x43a   :  { %1523 = vpow2.f32 %v343_v45 }
 0x43b   :  { %1525 = vpow2.f32 %v341_v46  ;;  %v464_v60 = vpop.f32.mrf.mxu3 }
 0x43c   :  { %v465_v61 = vadd.f32 %v464_v60, %v1798_v55 }
 0x43e   :  { %v395_v47 = vpop.f32.mrf.mxu2  ;;  %v470_v62 = vsel %vm244_vm9, %v465_v61, -inf }
 0x43f   :  { %v396_v49 = vadd.f32 %v395_v47, %v1791_v51 }
 0x440   :  { %v1524_v50 = vpop.eup %1523 }
 0x441   :  { %v400_v52 = vsel %vm244_vm9, %v396_v49, -inf  ;;  %v348_v53 = vsel %vm244_vm9, %v1524_v50, 0.0  ;;  %v1526_v54 = vpop.eup %1525 }
 0x442   :  { %401 = vmax.xlane.f32.xlu2 %v400_v52  ;;  %349 = vadd.xlane.f32.xlu1 %v348_v53  ;;  %v345_v59 = vsel %vm244_vm9, %v1526_v54, 0.0 }
 0x446   :  { %v397_v56 = vpop.f32.mrf.mxu2 }
 0x447   :  { %v398_v57 = vadd.f32 %v397_v56, %v1798_v55 }
 0x449   :  { %v403_v58 = vsel %vm244_vm9, %v398_v57, -inf }
 0x44a   :  { %404 = vmax.xlane.f32.xlu0 %v403_v58  ;;  %346 = vadd.xlane.f32.xlu2 %v345_v59 }
 0x452   :  { %471 = vmax.xlane.f32.xlu0 %v470_v62 }
 0x466   :  { %356 = vrot.lane.b32.xlu0 %v1778_v43, %s1610_s21 }
 0x46e   :  { %423 = vrot.lane.b32.xlu0 %v1778_v43, %s1612_s22 }
 0x476   :  { %547 = vrot.lane.b32.xlu0 %v1717_v4, %s1607_s14 }
 0x47e   :  { %545 = vrot.lane.b32.xlu0 %v1735_v10, %s1607_s14 }
 0x4aa   :  { %v469_v63 = vpop.xlane.xlu1 %468 }
 0x4ab   :  { %v473_v0 = vsub.f32 %v463_v37, %v469_v63 }
 0x4ad   :  { %v475_v1 = vmul.f32 1.442695, %v473_v0 }
 0x4af   :  { %1527 = vpow2.f32 %v475_v1 }
 0x4b5   :  { %v1528_v3 = vpop.eup %1527  ;;  %v402_v5 = vpop.xlane.xlu2 %401 }
 0x4b6   :  { %v406_v6 = vsub.f32 %v396_v49, %v402_v5  ;;  %v479_v7 = vsel %vm244_vm9, %v1528_v3, 0.0  ;;  %v350_v28 = vpop.xlane.xlu1 %349 }
 0x4b7   :  { %480 = vadd.xlane.f32.xlu2 %v479_v7 }
 0x4b8   :  { %v408_v9 = vmul.f32 1.442695, %v406_v6 }
 0x4ba   :  { %1529 = vpow2.f32 %v408_v9 }
 0x4bd   :  { %v405_v11 = vpop.xlane.xlu0 %404  ;;  %v347_v25 = vpop.xlane.xlu2 %346 }
 0x4be   :  { %v407_v12 = vsub.f32 %v398_v57, %v405_v11 }
 0x4c0   :  { %v1530_v13 = vpop.eup %1529  ;;  %v410_v15 = vmul.f32 1.442695, %v407_v12 }
 0x4c1   :  { %v412_v17 = vsel %vm244_vm9, %v1530_v13, 0.0 }
 0x4c2   :  { %1531 = vpow2.f32 %v410_v15  ;;  %413 = vadd.xlane.f32.xlu2 %v412_v17 }
 0x4c5   :  { %v472_v18 = vpop.xlane.xlu0 %471 }
 0x4c6   :  { %v474_v19 = vsub.f32 %v465_v61, %v472_v18 }
 0x4c8   :  { %v1532_v22 = vpop.eup %1531  ;;  %v477_v23 = vmul.f32 1.442695, %v474_v19 }
 0x4c9   :  { %v415_v24 = vsel %vm244_vm9, %v1532_v22, 0.0 }
 0x4ca   :  { %1533 = vpow2.f32 %v477_v23  ;;  %416 = vadd.xlane.f32.xlu1 %v415_v24 }
 0x4cb   :  { %1535 = vrcp.f32 %v347_v25  ;;  %v1885_v25 = vperm.slane %v1696_v48, 4 }
 0x4cc   :  { %1537 = vrcp.f32 %v350_v28 }
 0x4d0   :  { %v1534_v29 = vpop.eup %1533 }
 0x4d1   :  { %v482_v30 = vsel %vm244_vm9, %v1534_v29, 0.0  ;;  %v1536_v31 = vpop.eup %1535 }
 0x4d2   :  { %483 = vadd.xlane.f32.xlu1 %v482_v30  ;;  %v1538_v33 = vpop.eup %1537  ;;  %v353_v36 = vmul.f32 %v1536_v31, %v1526_v54 }
 0x4d3   :  { %v354_v37 = vmul.f32 %v1538_v33, %v1524_v50 }
 0x4d5   :  { %v355_v39 = vpack.c.bf16 %v354_v37, %v353_v36 }
 0x4d8   :  { %v357_v38 = vpop.permute.xlu0 %356 }
 0x4d9   :  { %369 = vmatpush.bf16.msrb.mxu1 %v357_v38 }
 0x4da   :  { %490 = vrot.lane.b32.xlu2 %v1778_v43, %s1611_s1 }
 0x4dc   :  { %1381 = vmatmul.msk.bf16.vlgmr.msrb.gmra.mxu1 %vm244_vm9, %v355_v39 }
 0x4e0   :  { %v424_v40 = vpop.permute.xlu0 %423 }
 0x4e1   :  { %436 = vmatpush.bf16.msra.mxu0 %v424_v40  ;;  %v1613_v40 = vmov 64.0  }
 0x4e8   :  { %v1859_v1 = vpop.permute.xlu0 %547 }
 0x4eb   :  { %549 = vrot.lane.b32.xlu1 %v1689_v35, %s1607_s14 }
 0x4f0   :  { %v1865_v5 = vpop.permute.xlu0 %545 }
 0x52a   :  { %v481_v42 = vpop.xlane.xlu2 %480 }
 0x535   :  { %v414_v44 = vpop.xlane.xlu2 %413 }
 0x536   :  { %1539 = vrcp.f32 %v414_v44 }
 0x53c   :  { %v1540_v47 = vpop.eup %1539 }
 0x53d   :  { %v417_v45 = vpop.xlane.xlu1 %416  ;;  %v491_v46 = vpop.permute.xlu2 %490  ;;  %v420_v49 = vmul.f32 %v1540_v47, %v1530_v13  ;;  %v1459_v47 = vld [vmem:[%s2173_s3 + $0x58] sm:$0xf0] }
 0x53e   :  { %1541 = vrcp.f32 %v417_v45  ;;  %503 = vmatpush.bf16.msra.mxu1 %v491_v46 }
 0x53f   :  { %1543 = vrcp.f32 %v481_v42 }
 0x542   :  { %824 = vmatpush.bf16.msrb.mxu1 %v1684_v32 }
 0x544   :  { %v1542_v43 = vpop.eup %1541 }
 0x545   :  { %v421_v50 = vmul.f32 %v1542_v43, %v1532_v22  ;;  %v484_v52 = vpop.xlane.xlu1 %483  ;;  %v1544_v54 = vpop.eup %1543 }
 0x546   :  { %825 = vmatpush.bf16.msrb.mxu1 %v1712_v2  ;;  %1545 = vrcp.f32 %v484_v52  ;;  %v487_v57 = vmul.f32 %v1544_v54, %v1528_v3  ;;  %v1456_v52 = vld [vmem:[%s2173_s3 + $0x40] sm:$0xf0] }
 0x547   :  { %v422_v53 = vpack.c.bf16 %v421_v50, %v420_v49  ;;  %1547 = vrcp.f32 %v1613_v40  ;;  %v1397_v50 = vld [vmem:[%s2173_s3 + $0x38] sm:$0xf] }
 0x548   :  { %v1922_v54 = vor.u32 %v1456_v52, %v1397_v50  ;;  %v1987_v50 = vld [vmem:[%s2176_s5 + $0x18] sm:$0xff]  ;;  %v1993_v52 = vld [vmem:[%s2176_s5 + $0x10] sm:$0xff] }
 0x549   :  { %1383 = vmatmul.msk.bf16.vlgmr.msra.gmra.mxu0 %vm244_vm9, %v422_v53 }
 0x54a   :  { %826 = vmatpush.bf16.msrb.mxu1 %v1729_v8 }
 0x54c   :  { %v1546_v56 = vpop.eup %1545 }
 0x54d   :  { %v488_v32 = vmul.f32 %v1546_v56, %v1534_v29  ;;  %v1548_v42 = vpop.eup %1547 }
 0x54e   :  { %827 = vmatpush.bf16.msrb.mxu1 %v1748_v14  ;;  %v581_v44 = vmul.f32 64.0, %v1548_v42  ;;  %vm585_vm11 = vweird.f32 %v1548_v42 }
 0x54f   :  { %v489_v58 = vpack.c.bf16 %v488_v32, %v487_v57  ;;  %v1393_v32 = vld [vmem:[%s2173_s3 + $0x20] sm:$0xf] }
 0x550   :  { %v582_v45 = vsub.f32 1.0, %v581_v44 }
 0x551   :  { %1385 = vmatmul.msk.bf16.vlgmr.msra.gmra.mxu1 %vm244_vm9, %v489_v58  ;;  %v1453_v58 = vld [vmem:[%s2173_s3 + $0x28] sm:$0xf0] }
 0x552   :  { %v583_v46 = vmul.f32 %v1548_v42, %v582_v45 }
 0x554   :  { %v584_v43 = vadd.f32 %v1548_v42, %v583_v46 }
 0x556   :  { %v1920_v53 = vsel %vm585_vm11, %v1548_v42, %v584_v43  ;;  %v1954_v42 = vperm.slane %v1696_v48, 6  ;;  %v1981_v43 = vld [vmem:[%s2176_s5 + $0x20] sm:$0xff] }
 0x559   :  { %v371_v2 = vpop.f32.mrf.mxu1 }
 0x55d   :  { %v1861_v3 = vpop.permute.xlu1 %549 }
 0x55e   :  { %562 = vmatpush.bf16.msra.mxu2 %v1861_v3 }
 0x561   :  { %v373_v59 = vpop.f32.mrf.mxu1 }
 0x562   :  { %v1479_v60 = vpack.i.bf16 %v373_v59, %v371_v2  ;;  %563 = vmatpush.bf16.msra.mxu2 %v1859_v1  ;;  %v1932_v59 = vor.u32 %v1453_v58, %v1393_v32  ;;  %v2008_v32 = vperm.slane %v1696_v48, 7 }
 0x564   :  { %1480 = vrot.lane.b32.xlu0 %v1479_v60, %s1609_s20 }
 0x566   :  { %564 = vmatpush.bf16.msra.mxu2 %v1865_v5 }
 0x56c   :  { %543 = vrot.lane.b32.xlu0 %v1753_v16, %s1607_s14 }
 0x5c6   :  { %v438_v8 = vpop.f32.mrf.mxu0 }
 0x5ce   :  { %v440_v61 = vpop.f32.mrf.mxu0  ;;  %v505_v62 = vpop.f32.mrf.mxu1 }
 0x5cf   :  { %v1484_v63 = vpack.i.bf16 %v440_v61, %v438_v8 }
 0x5d1   :  { %1485 = vrot.lane.b32.xlu2 %v1484_v63, %s1608_s15  ;;  %v1450_v63 = vld [vmem:[%s2173_s3 + $0x10] sm:$0xf0] }
 0x5d6   :  { %v507_v14 = vpop.f32.mrf.mxu1  ;;  %v1481_v6 = vpop.permute.xlu0 %1480 }
 0x5d7   :  { %v1489_v0 = vpack.i.bf16 %v507_v14, %v505_v62  ;;  %v1483_v11 = vunpack.i.h.bf16 %v1481_v6  ;;  %v1482_v12 = vunpack.i.l.bf16 %v1481_v6  ;;  %v1389_v62 = vld [vmem:[%s2173_s3 + $0x8] sm:$0xf] }
 0x5d8   :  { %v1942_v14 = vor.u32 %v1450_v63, %v1389_v62 }
 0x5d9   :  { %1490 = vrot.lane.b32.xlu1 %v1489_v0, %s1606_s13  ;;  %v535_v18 = vsel %vm244_vm9, %v1820_v41, %v1483_v11  ;;  %v534_v19 = vsel %vm244_vm9, %v1817_v34, %v1482_v12 }
 0x5de   :  { %v1868_v7 = vpop.permute.xlu0 %543 }
 0x5df   :  { %565 = vmatpush.bf16.msra.mxu2 %v1868_v7 }
 0x5e3   :  { %838 = vmatpush.bf16.msrb.mxu2 %v1689_v35 }
 0x5e7   :  { %839 = vmatpush.bf16.msrb.mxu2 %v1717_v4 }
 0x5eb   :  { %840 = vmatpush.bf16.msrb.mxu2 %v1735_v10 }
 0x5ef   :  { %841 = vmatpush.bf16.msrb.mxu2 %v1753_v16 }
 0x62b   :  { %v1486_v9 = vpop.permute.xlu2 %1485 }
 0x62c   :  { %v1488_v13 = vunpack.i.h.bf16 %v1486_v9  ;;  %v1487_v15 = vunpack.i.l.bf16 %v1486_v9 }
 0x62e   :  { %v537_v4 = vsel %vm67_vm0, %v535_v18, %v1488_v13  ;;  %v536_v10 = vsel %vm67_vm0, %v534_v19, %v1487_v15 }
 0x64b   :  { %v1491_v17 = vpop.permute.xlu1 %1490 }
 0x64c   :  { %v1493_v35 = vunpack.i.h.bf16 %v1491_v17  ;;  %v1492_v22 = vunpack.i.l.bf16 %v1491_v17 }
 0x64e   :  { %v539_v16 = vsel %vm538_vm10, %v536_v10, %v1492_v22  ;;  %v540_v23 = vsel %vm538_vm10, %v537_v4, %v1493_v35 }
 0x64f   :  { %v541_v24 = vpack.c.bf16 %v540_v23, %v539_v16 }
 0x651   :  { %1386 = vmatmul.msk.bf16.vlgmr.msra.gmra.mxu2 %vm203_vm8, %v541_v24 }
 0x6d4   :  { %v567_v41 = vpop.f32.mrf.mxu2 }
 0x6d5   :  { %v568_v28 = vadd.f32 %v567_v41, %v1885_v25 }
 0x6d7   :  { %v1889_v34 = vadd.f32 %v568_v28, %v1758_v20 }
 0x6d9   :  { %v574_v29 = vsel %vm203_vm8, %v1889_v34, 0.0  ;;  %v589_v30 = vmul.f32 %v1889_v34, %v1889_v34 }
 0x6da   :  { %575 = vadd.xlane.f32.xlu2 %v574_v29 }
 0x6db   :  { %v591_v31 = vsel %vm203_vm8, %v589_v30, 0.0 }
 0x6dc   :  { %v569_v33 = vpop.f32.mrf.mxu2  ;;  %592 = vadd.xlane.f32.xlu0 %v591_v31  ;;  %v1949_v31 = vperm.slane %v1696_v48, 5 }
 0x6dd   :  { %v570_v36 = vadd.f32 %v569_v33, %v1885_v25 }
 0x6df   :  { %v1898_v37 = vadd.f32 %v570_v36, %v1760_v21  ;;  %v1401_v21 = vld [vmem:[%s2173_s3 + $0x50] sm:$0xf] }
 0x6e0   :  { %v1911_v49 = vor.u32 %v1459_v47, %v1401_v21  ;;  %v1969_v21 = vld [vmem:[%s2176_s5 + $0x30] sm:$0xff]  ;;  %v1975_v47 = vld [vmem:[%s2176_s5 + $0x28] sm:$0xff] }
 0x6e1   :  { %v577_v20 = vsel %vm203_vm8, %v1898_v37, 0.0  ;;  %v590_v38 = vmul.f32 %v1898_v37, %v1898_v37 }
 0x6e2   :  { %578 = vadd.xlane.f32.xlu1 %v577_v20  ;;  %668 = vmatpush.bf16.msrb.mxu0 %v1911_v49 }
 0x6e3   :  { %v594_v39 = vsel %vm203_vm8, %v590_v38, 0.0 }
 0x6e4   :  { %595 = vadd.xlane.f32.xlu2 %v594_v39 }
 0x6e6   :  { %669 = vmatpush.bf16.msrb.mxu0 %v1922_v54 }
 0x6ea   :  { %670 = vmatpush.bf16.msrb.mxu0 %v1932_v59 }
 0x6ee   :  { %671 = vmatpush.bf16.msrb.mxu0 %v1942_v14 }
 0x74d   :  { %v576_v56 = vpop.xlane.xlu2 %575 }
 0x74e   :  { %v587_v57 = vmul.f32 %v1920_v53, %v576_v56  ;;  %v1999_v56 = vld [vmem:[%s2176_s5 + $0x8] sm:$0xff] }
 0x74f   :  { %v593_v2 = vpop.xlane.xlu0 %592 }
 0x750   :  { %v599_v60 = vmul.f32 %v587_v57, %v587_v57  ;;  %v597_v8 = vmul.f32 %v593_v2, %v1920_v53  ;;  %v603_v29 = vsub.f32 %v1889_v34, %v587_v57  ;;  %v2005_v57 = vld [vmem:[%s2176_s5] sm:$0xff] }
 0x752   :  { %v601_v61 = vsub.f32 %v597_v8, %v599_v60 }
 0x754   :  { %v605_v0 = vadd.f32 1e-12, %v601_v61 }
 0x755   :  { %v579_v6 = vpop.xlane.xlu1 %578 }
 0x756   :  { %1549 = vrsqrt.f32 %v605_v0  ;;  %v588_v9 = vmul.f32 %v1920_v53, %v579_v6  ;;  %vm613_vm13 = vweird.f32 %v605_v0 }
 0x757   :  { %v596_v11 = vpop.xlane.xlu2 %595 }
 0x758   :  { %v600_v12 = vmul.f32 %v588_v9, %v588_v9  ;;  %v598_v13 = vmul.f32 %v596_v11, %v1920_v53  ;;  %v604_v20 = vsub.f32 %v1898_v37, %v588_v9  ;;  %v1963_v37 = vld [vmem:[%s2176_s5 + $0x38] sm:$0xff] }
 0x759   :  { %746 = vmatpush.bf16.msrb.mxu3 %v1963_v37 }
 0x75a   :  { %v602_v15 = vsub.f32 %v598_v13, %v600_v12 }
 0x75c   :  { %v1550_v17 = vpop.eup %1549  ;;  %v606_v18 = vadd.f32 1e-12, %v602_v15 }
 0x75d   :  { %v608_v19 = vmul.f32 %v1550_v17, %v605_v0  ;;  %vm614_vm12 = vweird.f32 %v1550_v17  ;;  %747 = vmatpush.bf16.msrb.mxu3 %v1969_v21 }
 0x75e   :  { %1551 = vrsqrt.f32 %v606_v18  ;;  %vm615_vm14 = vmor %vm613_vm13, %vm614_vm12  ;;  %vm623_vm1 = vweird.f32 %v606_v18 }
 0x75f   :  { %v609_v35 = vmul.f32 %v1550_v17, %v608_v19 }
 0x761   :  { %v610_v22 = vmul.f32 0.5, %v609_v35  ;;  %748 = vmatpush.bf16.msrb.mxu3 %v1975_v47 }
 0x763   :  { %v611_v4 = vsub.f32 1.5, %v610_v22 }
 0x764   :  { %v1552_v10 = vpop.eup %1551 }
 0x765   :  { %v612_v16 = vmul.f32 %v1550_v17, %v611_v4  ;;  %v618_v23 = vmul.f32 %v1552_v10, %v606_v18  ;;  %vm624_vm15 = vweird.f32 %v1552_v10  ;;  %749 = vmatpush.bf16.msrb.mxu3 %v1981_v43 }
 0x766   :  { %vm625_vm2 = vmor %vm623_vm1, %vm624_vm15 }
 0x767   :  { %v619_v24 = vmul.f32 %v1552_v10, %v618_v23  ;;  %v616_v41 = vsel %vm615_vm14, %v1550_v17, %v612_v16  ;;  %v26_v23 = vld [vmem:[%s2174_s2 + $0x10] sm:$0x7] }
 0x768   :  { %v627_v33 = vmul.f32 %v616_v41, %v603_v29 }
 0x769   :  { %v620_v28 = vmul.f32 0.5, %v619_v24  ;;  %750 = vmatpush.bf16.msrb.mxu3 %v1987_v50  ;;  %v2016_v24 = vperm.slane %v26_v23, 0 }
 0x76a   :  { %v630_v39 = vmul.f32 %v1949_v31, %v627_v33 }
 0x76b   :  { %v621_v30 = vsub.f32 1.5, %v620_v28 }
 0x76c   :  { %v633_v44 = vadd.f32 %v1954_v42, %v630_v39 }
 0x76d   :  { %v622_v36 = vmul.f32 %v1552_v10, %v621_v30  ;;  %751 = vmatpush.bf16.msrb.mxu3 %v1993_v52 }
 0x76f   :  { %v626_v38 = vsel %vm625_vm2, %v1552_v10, %v622_v36 }
 0x770   :  { %v628_v40 = vmul.f32 %v626_v38, %v604_v20 }
 0x771   :  { %752 = vmatpush.bf16.msrb.mxu3 %v1999_v56 }
 0x772   :  { %v631_v34 = vmul.f32 %v1949_v31, %v628_v40 }
 0x774   :  { %v634_v45 = vadd.f32 %v1954_v42, %v631_v34 }
 0x775   :  { %753 = vmatpush.bf16.msrb.mxu3 %v2005_v57 }
 0x776   :  { %v635_v46 = vpack.c.bf16 %v634_v45, %v633_v44 }
 0x778   :  { %1403 = vmatmul.msk.bf16.vlgmr.msrb.gmra.mxu0 %vm203_vm8, %v635_v46 }
 0x7f5   :  { %v673_v58 = vpop.f32.mrf.mxu0 }
 0x7f6   :  { %v674_v2 = vadd.f32 %v673_v58, %v2008_v32 }
 0x7f8   :  { %v680_v60 = vmul.f32 0.044715, %v674_v2  ;;  %v678_v19 = vmul.f32 0.5, %v674_v2 }
 0x7fa   :  { %v682_v8 = vmul.f32 %v680_v60, %v674_v2 }
 0x7fc   :  { %v684_v61 = vmul.f32 %v682_v8, %v674_v2 }
 0x7fd   :  { %v675_v62 = vpop.f32.mrf.mxu0 }
 0x7fe   :  { %v686_v63 = vadd.f32 %v684_v61, %v674_v2  ;;  %v676_v0 = vadd.f32 %v675_v62, %v2008_v32 }
 0x800   :  { %v681_v6 = vmul.f32 0.044715, %v676_v0  ;;  %v688_v9 = vmul.f32 0.7978846, %v686_v63  ;;  %v679_v35 = vmul.f32 0.5, %v676_v0 }
 0x802   :  { %v683_v11 = vmul.f32 %v681_v6, %v676_v0  ;;  %1553 = vtanh.f32 %v688_v9 }
 0x804   :  { %v685_v12 = vmul.f32 %v683_v11, %v676_v0 }
 0x806   :  { %v687_v13 = vadd.f32 %v685_v12, %v676_v0 }
 0x808   :  { %v689_v48 = vmul.f32 0.7978846, %v687_v13  ;;  %v1554_v15 = vpop.eup %1553 }
 0x809   :  { %v692_v17 = vadd.f32 1.0, %v1554_v15 }
 0x80a   :  { %1555 = vtanh.f32 %v689_v48 }
 0x80b   :  { %v694_v4 = vmul.f32 %v692_v17, %v678_v19 }
 0x810   :  { %v1556_v18 = vpop.eup %1555 }
 0x811   :  { %v693_v22 = vadd.f32 1.0, %v1556_v18 }
 0x813   :  { %v695_v10 = vmul.f32 %v693_v22, %v679_v35 }
 0x815   :  { %v696_v16 = vpack.c.bf16 %v695_v10, %v694_v4 }
 0x817   :  { %754 = vmatmul.bf16.vlgmr.msrb.gmra.mxu3 %v696_v16 }
 0x89a   :  { %v755_v41 = vpop.f32.mrf.mxu3 }
 0x89b   :  { %v756_v28 = vadd.f32 %v755_v41, %v2016_v24 }
 0x89d   :  { %v760_v29 = vadd.f32 %v756_v28, %v633_v44 }
 0x89f   :  { %v762_v30 = vsel %vm203_vm8, %v760_v29, 0.0  ;;  %v770_v33 = vmul.f32 %v760_v29, %v760_v29 }
 0x8a0   :  { %763 = vadd.xlane.f32.xlu1 %v762_v30  ;;  %v2028_v30 = vperm.slane %v26_v23, 1 }
 0x8a1   :  { %v772_v36 = vsel %vm203_vm8, %v770_v33, 0.0 }
 0x8a2   :  { %v757_v20 = vpop.f32.mrf.mxu3  ;;  %773 = vadd.xlane.f32.xlu0 %v772_v36 }
 0x8a3   :  { %v758_v38 = vadd.f32 %v757_v20, %v2016_v24 }
 0x8a5   :  { %v761_v39 = vadd.f32 %v758_v38, %v634_v45 }
 0x8a7   :  { %v765_v40 = vsel %vm203_vm8, %v761_v39, 0.0  ;;  %v771_v34 = vmul.f32 %v761_v39, %v761_v39 }
 0x8a8   :  { %766 = vadd.xlane.f32.xlu2 %v765_v40  ;;  %v2030_v40 = vperm.slane %v26_v23, 2 }
 0x8a9   :  { %v775_v46 = vsel %vm203_vm8, %v771_v34, 0.0 }
 0x8aa   :  { %776 = vadd.xlane.f32.xlu1 %v775_v46 }
 0x913   :  { %v764_v58 = vpop.xlane.xlu1 %763 }
 0x914   :  { %v768_v44 = vmul.f32 %v764_v58, %v1920_v53 }
 0x915   :  { %v774_v2 = vpop.xlane.xlu0 %773 }
 0x916   :  { %v780_v60 = vmul.f32 %v768_v44, %v768_v44  ;;  %v778_v8 = vmul.f32 %v774_v2, %v1920_v53  ;;  %v784_v41 = vsub.f32 %v760_v29, %v768_v44 }
 0x918   :  { %v782_v61 = vsub.f32 %v778_v8, %v780_v60 }
 0x91a   :  { %v786_v62 = vadd.f32 1e-12, %v782_v61 }
 0x91b   :  { %v767_v63 = vpop.xlane.xlu2 %766 }
 0x91c   :  { %1557 = vrsqrt.f32 %v786_v62  ;;  %v769_v45 = vmul.f32 %v767_v63, %v1920_v53  ;;  %vm794_vm4 = vweird.f32 %v786_v62 }
 0x91d   :  { %v777_v0 = vpop.xlane.xlu1 %776 }
 0x91e   :  { %v781_v6 = vmul.f32 %v769_v45, %v769_v45  ;;  %v779_v9 = vmul.f32 %v777_v0, %v1920_v53  ;;  %v785_v20 = vsub.f32 %v761_v39, %v769_v45 }
 0x920   :  { %v783_v11 = vsub.f32 %v779_v9, %v781_v6 }
 0x922   :  { %v1558_v12 = vpop.eup %1557  ;;  %v787_v13 = vadd.f32 1e-12, %v783_v11 }
 0x923   :  { %v789_v48 = vmul.f32 %v1558_v12, %v786_v62  ;;  %vm795_vm3 = vweird.f32 %v1558_v12 }
 0x924   :  { %1559 = vrsqrt.f32 %v787_v13  ;;  %vm796_vm5 = vmor %vm794_vm4, %vm795_vm3  ;;  %vm804_vm7 = vweird.f32 %v787_v13 }
 0x925   :  { %v790_v15 = vmul.f32 %v1558_v12, %v789_v48 }
 0x927   :  { %v791_v17 = vmul.f32 0.5, %v790_v15 }
 0x929   :  { %v792_v18 = vsub.f32 1.5, %v791_v17 }
 0x92a   :  { %v1560_v19 = vpop.eup %1559 }
 0x92b   :  { %v793_v35 = vmul.f32 %v1558_v12, %v792_v18  ;;  %v799_v22 = vmul.f32 %v1560_v19, %v787_v13  ;;  %vm805_vm6 = vweird.f32 %v1560_v19 }
 0x92c   :  { %vm806_vm11 = vmor %vm804_vm7, %vm805_vm6 }
 0x92d   :  { %v800_v4 = vmul.f32 %v1560_v19, %v799_v22  ;;  %v797_v10 = vsel %vm796_vm5, %v1558_v12, %v793_v35 }
 0x92e   :  { %v808_v33 = vmul.f32 %v797_v10, %v784_v41 }
 0x92f   :  { %v801_v16 = vmul.f32 0.5, %v800_v4 }
 0x930   :  { %v811_v34 = vmul.f32 %v2028_v30, %v808_v33 }
 0x931   :  { %v802_v28 = vsub.f32 1.5, %v801_v16 }
 0x932   :  { %v2035_v2 = vadd.f32 %v2030_v40, %v811_v34 }
 0x933   :  { %v803_v36 = vmul.f32 %v1560_v19, %v802_v28 }
 0x935   :  { %v807_v38 = vsel %vm806_vm11, %v1560_v19, %v803_v36 }
 0x936   :  { %v809_v46 = vmul.f32 %v807_v38, %v785_v20 }
 0x938   :  { %v812_v58 = vmul.f32 %v2028_v30, %v809_v46 }
 0x93a   :  { %v2038_v29 = vadd.f32 %v2030_v40, %v812_v58 }
 0x93c   :  { %v816_v44 = vpack.c.bf16 %v2038_v29, %v2035_v2 }
 0x93e   :  { %1436 = vmatmul.msk.bf16.vlgmr.msrb.gmra.mxu1 %vm203_vm8, %v816_v44  ;;  %1437 = vmatmul.msk.bf16.vlgmr.msrb.gmra.mxu2 %vm203_vm8, %v816_v44 }
 0x9bb   :  { %v829_v23 = vpop.f32.mrf.mxu1 }
 0x9bc   :  { %v830_v61 = vadd.f32 %v829_v23, %v1770_v26 }
 0x9c1   :  { %v843_v39 = vpop.f32.mrf.mxu2 }
 0x9c2   :  { %v844_v60 = vadd.f32 %v843_v39, %v1772_v27 }
 0x9c3   :  { %v831_v8 = vpop.f32.mrf.mxu1 }
 0x9c4   :  { %v848_v63 = vpack.c.bf16 %v844_v60, %v830_v61  ;;  %v832_v45 = vadd.f32 %v831_v8, %v1770_v26 }
 0x9c6   :  { %v852_v9 = vunpack.c.l.b16 %v848_v63  ;;  %v900_v11 = vunpack.c.h.b16 %v848_v63 }
 0x9c9   :  { %v845_v62 = vpop.f32.mrf.mxu2 }
 0x9ca   :  { %v846_v0 = vadd.f32 %v845_v62, %v1772_v27 }
 0x9cc   :  { %v849_v6 = vpack.c.bf16 %v846_v0, %v832_v45 }
 0x9ce   :  { %v853_v12 = vunpack.c.l.b16 %v849_v6  ;;  %v901_v13 = vunpack.c.h.b16 %v849_v6 }
 0x9d0   :  { %v854_v48 = vpack.c.b16 %v853_v12, %v852_v9  ;;  %v2048_v15 = vpack.c.b16 %v901_v13, %v900_v11 }
 0x9d2   :  { %914 = vmatpush.bf16.msra.mxu1 %v2048_v15  ;;  %921 = vrot.lane.b32.xlu1 %v854_v48, %s1610_s21 }
 0x9d3   :  { %855 = vrot.lane.b32.xlu0 %v854_v48, %s1607_s14  ;;  %923 = vrot.lane.b32.xlu2 %v854_v48, %s1606_s13 }
 0x9da   :  { %988 = vrot.lane.b32.xlu1 %v854_v48, %s1612_s22 }
 0x9db   :  { %990 = vrot.lane.b32.xlu0 %v854_v48, %s1608_s15  ;;  %1057 = vrot.lane.b32.xlu2 %v854_v48, %s1609_s20 }
 0x9e3   :  { %1055 = vrot.lane.b32.xlu0 %v854_v48, %s1611_s1 }
 0xa2d   :  { %v924_v26 = vpop.permute.xlu2 %923 }
 0xa2e   :  { %v929_v27 = vsel %vm244_vm9, %v924_v26, 0 }
 0xa2f   :  { %938 = vmatpush.bf16.xpose.msra.mxu2 %v929_v27 }
 0xa35   :  { %v1058_v17 = vpop.permute.xlu2 %1057 }
 0xa36   :  { %v1063_v18 = vsel %vm244_vm9, %v1058_v17, 0 }
 0xa37   :  { %1072 = vmatpush.bf16.xpose.msrb.mxu2 %v1063_v18 }
 0xa44   :  { %v922_v19 = vpop.permute.xlu1 %921 }
 0xa45   :  { %v856_v35 = vpop.permute.xlu0 %855  ;;  %1440 = vmatmul.msk.bf16.vlgmr.msra.gmra.mxu2 %vm244_vm9, %v922_v19 }
 0xa46   :  { %v861_v22 = vsel %vm244_vm9, %v856_v35, 0  ;;  %1261 = vmatpush.bf16.msra.mxu2 %v1963_v37 }
 0xa47   :  { %870 = vmatpush.bf16.xpose.msra.mxu0 %v861_v22 }
 0xa4a   :  { %1262 = vmatpush.bf16.msra.mxu2 %v1969_v21 }
 0xa4c   :  { %v989_v16 = vpop.permute.xlu1 %988 }
 0xa4d   :  { %v991_v4 = vpop.permute.xlu0 %990 }
 0xa4e   :  { %v996_v10 = vsel %vm244_vm9, %v991_v4, 0  ;;  %1438 = vmatmul.msk.bf16.vlgmr.msra.gmra.mxu0 %vm244_vm9, %v854_v48  ;;  %1263 = vmatpush.bf16.msra.mxu2 %v1975_v47 }
 0xa4f   :  { %1005 = vmatpush.bf16.xpose.msra.mxu3 %v996_v10 }
 0xa52   :  { %1264 = vmatpush.bf16.msra.mxu2 %v1981_v43 }
 0xa55   :  { %v1056_v41 = vpop.permute.xlu0 %1055 }
 0xa56   :  { %1442 = vmatmul.msk.bf16.vlgmr.msra.gmra.mxu3 %vm244_vm9, %v989_v16  ;;  %1444 = vmatmul.msk.bf16.vlgmr.msrb.gmra.mxu2 %vm244_vm9, %v1056_v41 }
 0xa57   :  { %1160 = vmatpush.bf16.msrb.mxu3 %v1861_v3  ;;  %1265 = vmatpush.bf16.msra.mxu2 %v1987_v50 }
 0xa5b   :  { %1161 = vmatpush.bf16.msrb.mxu3 %v1859_v1  ;;  %1266 = vmatpush.bf16.msra.mxu2 %v1993_v52 }
 0xa5f   :  { %1162 = vmatpush.bf16.msrb.mxu3 %v1865_v5  ;;  %1267 = vmatpush.bf16.msra.mxu2 %v1999_v56 }
 0xa63   :  { %1163 = vmatpush.bf16.msrb.mxu3 %v1868_v7  ;;  %1268 = vmatpush.bf16.msra.mxu2 %v2005_v57 }
 0xac8   :  { %v940_v3 = vpop.f32.mrf.mxu2 }
 0xac9   :  { %v941_v1 = vadd.f32 %v940_v3, %v1791_v51 }
 0xacb   :  { %v872_v37 = vpop.f32.mrf.mxu0  ;;  %v945_v21 = vsel %vm244_vm9, %v941_v1, -inf }
 0xacc   :  { %v873_v47 = vadd.f32 %v872_v37, %v1791_v51  ;;  %946 = vmax.xlane.f32.xlu0 %v945_v21 }
 0xace   :  { %v877_v43 = vsel %vm244_vm9, %v873_v47, -inf }
 0xacf   :  { %878 = vmax.xlane.f32.xlu2 %v877_v43 }
 0xad0   :  { %v942_v5 = vpop.f32.mrf.mxu2 }
 0xad1   :  { %v943_v50 = vadd.f32 %v942_v5, %v1798_v55 }
 0xad3   :  { %v874_v7 = vpop.f32.mrf.mxu0  ;;  %v948_v57 = vsel %vm244_vm9, %v943_v50, -inf }
 0xad4   :  { %v875_v52 = vadd.f32 %v874_v7, %v1798_v55 }
 0xad6   :  { %v880_v56 = vsel %vm244_vm9, %v875_v52, -inf }
 0xad7   :  { %881 = vmax.xlane.f32.xlu1 %v880_v56  ;;  %949 = vmax.xlane.f32.xlu2 %v948_v57 }
 0xad9   :  { %v1007_v28 = vpop.f32.mrf.mxu3  ;;  %v1074_v33 = vpop.f32.mrf.mxu2 }
 0xada   :  { %v1008_v36 = vadd.f32 %v1007_v28, %v1791_v51  ;;  %v1075_v20 = vadd.f32 %v1074_v33, %v1791_v51 }
 0xadc   :  { %v1012_v38 = vsel %vm244_vm9, %v1008_v36, -inf  ;;  %v1079_v34 = vsel %vm244_vm9, %v1075_v20, -inf }
 0xadf   :  { %1013 = vmax.xlane.f32.xlu1 %v1012_v38  ;;  %1080 = vmax.xlane.f32.xlu2 %v1079_v34 }
 0xae1   :  { %v1009_v46 = vpop.f32.mrf.mxu3  ;;  %v1076_v58 = vpop.f32.mrf.mxu2 }
 0xae2   :  { %v1010_v44 = vadd.f32 %v1009_v46, %v1798_v55  ;;  %v1077_v23 = vadd.f32 %v1076_v58, %v1798_v55 }
 0xae4   :  { %v1015_v39 = vsel %vm244_vm9, %v1010_v44, -inf  ;;  %v1082_v60 = vsel %vm244_vm9, %v1077_v23, -inf }
 0xae5   :  { %1016 = vmax.xlane.f32.xlu0 %v1015_v39 }
 0xae7   :  { %1083 = vmax.xlane.f32.xlu1 %v1082_v60 }
 0xb3f   :  { %v947_v8 = vpop.xlane.xlu0 %946 }
 0xb40   :  { %v951_v51 = vsub.f32 %v941_v1, %v947_v8 }
 0xb42   :  { %v953_v61 = vmul.f32 1.442695, %v951_v51  ;;  %v879_v62 = vpop.xlane.xlu2 %878 }
 0xb43   :  { %v883_v63 = vsub.f32 %v873_v47, %v879_v62 }
 0xb44   :  { %1561 = vpow2.f32 %v953_v61 }
 0xb45   :  { %v885_v45 = vmul.f32 1.442695, %v883_v63 }
 0xb47   :  { %1563 = vpow2.f32 %v885_v45 }
 0xb4a   :  { %v2094_v0 = vpop.eup %1561  ;;  %v882_v6 = vpop.xlane.xlu1 %881 }
 0xb4b   :  { %v950_v9 = vpop.xlane.xlu2 %949  ;;  %v884_v11 = vsub.f32 %v875_v52, %v882_v6  ;;  %v957_v12 = vsel %vm244_vm9, %v2094_v0, 0.0 }
 0xb4c   :  { %v952_v55 = vsub.f32 %v943_v50, %v950_v9  ;;  %958 = vadd.xlane.f32.xlu1 %v957_v12 }
 0xb4d   :  { %v1564_v13 = vpop.eup %1563  ;;  %v887_v48 = vmul.f32 1.442695, %v884_v11 }
 0xb4e   :  { %v955_v26 = vmul.f32 1.442695, %v952_v55  ;;  %v889_v27 = vsel %vm244_vm9, %v1564_v13, 0.0 }
 0xb4f   :  { %1565 = vpow2.f32 %v887_v48  ;;  %890 = vadd.xlane.f32.xlu0 %v889_v27 }
 0xb50   :  { %1567 = vpow2.f32 %v955_v26 }
 0xb52   :  { %v1014_v17 = vpop.xlane.xlu1 %1013 }
 0xb53   :  { %v1081_v18 = vpop.xlane.xlu2 %1080  ;;  %v1018_v19 = vsub.f32 %v1008_v36, %v1014_v17 }
 0xb54   :  { %v1085_v35 = vsub.f32 %v1075_v20, %v1081_v18 }
 0xb55   :  { %v1566_v22 = vpop.eup %1565  ;;  %v1020_v4 = vmul.f32 1.442695, %v1018_v19 }
 0xb56   :  { %v1568_v10 = vpop.eup %1567  ;;  %v892_v16 = vsel %vm244_vm9, %v1566_v22, 0.0  ;;  %v1087_v3 = vmul.f32 1.442695, %v1085_v35 }
 0xb57   :  { %1569 = vpow2.f32 %v1020_v4  ;;  %893 = vadd.xlane.f32.xlu2 %v892_v16  ;;  %v960_v41 = vsel %vm244_vm9, %v1568_v10, 0.0 }
 0xb58   :  { %961 = vadd.xlane.f32.xlu0 %v960_v41  ;;  %v1017_v1 = vpop.xlane.xlu0 %1016  ;;  %1571 = vpow2.f32 %v1087_v3 }
 0xb59   :  { %v1019_v37 = vsub.f32 %v1010_v44, %v1017_v1 }
 0xb5a   :  { %v1084_v21 = vpop.xlane.xlu1 %1083 }
 0xb5b   :  { %v1022_v47 = vmul.f32 1.442695, %v1019_v37  ;;  %v1086_v43 = vsub.f32 %v1077_v23, %v1084_v21 }
 0xb5d   :  { %v1570_v5 = vpop.eup %1569  ;;  %1573 = vpow2.f32 %v1022_v47  ;;  %v1089_v7 = vmul.f32 1.442695, %v1086_v43 }
 0xb5e   :  { %v1024_v50 = vsel %vm244_vm9, %v1570_v5, 0.0  ;;  %v1572_v52 = vpop.eup %1571 }
 0xb5f   :  { %1025 = vadd.xlane.f32.xlu1 %v1024_v50  ;;  %1575 = vpow2.f32 %v1089_v7  ;;  %v1091_v28 = vsel %vm244_vm9, %v1572_v52, 0.0 }
 0xb63   :  { %v1574_v56 = vpop.eup %1573 }
 0xb64   :  { %v1027_v57 = vsel %vm244_vm9, %v1574_v56, 0.0 }
 0xb65   :  { %1028 = vadd.xlane.f32.xlu0 %v1027_v57  ;;  %v1576_v33 = vpop.eup %1575 }
 0xb66   :  { %v1094_v36 = vsel %vm244_vm9, %v1576_v33, 0.0 }
 0xb67   :  { %1092 = vadd.xlane.f32.xlu1 %v1091_v28 }
 0xb6d   :  { %1095 = vadd.xlane.f32.xlu0 %v1094_v36 }
 0xb6f   :  { %968 = vrot.lane.b32.xlu2 %v2048_v15, %s1610_s21 }
 0xb80   :  { %1035 = vrot.lane.b32.xlu1 %v2048_v15, %s1612_s22 }
 0xb81   :  { %1102 = vrot.lane.b32.xlu0 %v2048_v15, %s1611_s1 }
 0xbbf   :  { %v959_v38 = vpop.xlane.xlu1 %958 }
 0xbc2   :  { %v891_v20 = vpop.xlane.xlu0 %890 }
 0xbc3   :  { %1577 = vrcp.f32 %v891_v20 }
 0xbc4   :  { %1579 = vrcp.f32 %v959_v38 }
 0xbc9   :  { %v1578_v58 = vpop.eup %1577 }
 0xbca   :  { %v894_v34 = vpop.xlane.xlu2 %893  ;;  %v1580_v44 = vpop.eup %1579  ;;  %v897_v60 = vmul.f32 %v1578_v58, %v1564_v13 }
 0xbcb   :  { %v962_v46 = vpop.xlane.xlu0 %961  ;;  %1581 = vrcp.f32 %v894_v34  ;;  %v965_v61 = vmul.f32 %v1580_v44, %v2094_v0 }
 0xbcc   :  { %1583 = vrcp.f32 %v962_v46 }
 0xbd1   :  { %v1582_v23 = vpop.eup %1581 }
 0xbd2   :  { %v1584_v39 = vpop.eup %1583  ;;  %v898_v8 = vmul.f32 %v1582_v23, %v1566_v22  ;;  %v969_v51 = vpop.permute.xlu2 %968 }
 0xbd3   :  { %v966_v62 = vmul.f32 %v1584_v39, %v1568_v10  ;;  %981 = vmatpush.bf16.msrb.mxu0 %v969_v51  ;;  %v1026_v6 = vpop.xlane.xlu1 %1025 }
 0xbd4   :  { %v899_v15 = vpack.c.bf16 %v898_v8, %v897_v60 }
 0xbd5   :  { %v967_v63 = vpack.c.bf16 %v966_v62, %v965_v61 }
 0xbd6   :  { %1439 = vmatmul.msk.bf16.vlgmr.msra.gmra.mxu1 %vm244_vm9, %v899_v15 }
 0xbd7   :  { %1441 = vmatmul.msk.bf16.vlgmr.msrb.gmra.mxu0 %vm244_vm9, %v967_v63 }
 0xbd8   :  { %v1029_v45 = vpop.xlane.xlu0 %1028 }
 0xbd9   :  { %1585 = vrcp.f32 %v1029_v45 }
 0xbdb   :  { %v1093_v11 = vpop.xlane.xlu1 %1092 }
 0xbdf   :  { %v1586_v55 = vpop.eup %1585 }
 0xbe0   :  { %v1096_v9 = vpop.xlane.xlu0 %1095  ;;  %v1033_v48 = vmul.f32 %v1586_v55, %v1574_v56 }
 0xbe1   :  { %1587 = vrcp.f32 %v1096_v9 }
 0xbe2   :  { %1589 = vrcp.f32 %v1026_v6 }
 0xbe3   :  { %1591 = vrcp.f32 %v1093_v11 }
 0xbe7   :  { %v1588_v12 = vpop.eup %1587 }
 0xbe8   :  { %v1590_v13 = vpop.eup %1589  ;;  %v1100_v26 = vmul.f32 %v1588_v12, %v1576_v33 }
 0xbe9   :  { %v1592_v0 = vpop.eup %1591  ;;  %v1032_v27 = vmul.f32 %v1590_v13, %v1570_v5 }
 0xbea   :  { %v1099_v18 = vmul.f32 %v1592_v0, %v1572_v52 }
 0xbeb   :  { %v1034_v35 = vpack.c.bf16 %v1033_v48, %v1032_v27 }
 0xbec   :  { %v1101_v22 = vpack.c.bf16 %v1100_v26, %v1099_v18 }
 0xbf2   :  { %v1036_v17 = vpop.permute.xlu1 %1035 }
 0xbf3   :  { %v1103_v19 = vpop.permute.xlu0 %1102  ;;  %1048 = vmatpush.bf16.msrb.mxu1 %v1036_v17 }
 0xbf4   :  { %1115 = vmatpush.bf16.msra.mxu0 %v1103_v19 }
 0xbf6   :  { %1443 = vmatmul.msk.bf16.vlgmr.msrb.gmra.mxu1 %vm244_vm9, %v1034_v35 }
 0xbf7   :  { %1232 = vmatpush.bf16.msra.mxu1 %v1911_v49  ;;  %1445 = vmatmul.msk.bf16.vlgmr.msra.gmra.mxu0 %vm244_vm9, %v1101_v22 }
 0xbfb   :  { %1233 = vmatpush.bf16.msra.mxu1 %v1922_v54 }
 0xbff   :  { %1234 = vmatpush.bf16.msra.mxu1 %v1932_v59 }
 0xc03   :  { %1235 = vmatpush.bf16.msra.mxu1 %v1942_v14 }
 0xc53   :  { %v916_v41 = vpop.f32.mrf.mxu1 }
 0xc54   :  { %v983_v4 = vpop.f32.mrf.mxu0 }
 0xc5b   :  { %v918_v3 = vpop.f32.mrf.mxu1 }
 0xc5c   :  { %v985_v10 = vpop.f32.mrf.mxu0 }
 0xc5d   :  { %v1494_v16 = vpack.i.bf16 %v985_v10, %v983_v4 }
 0xc5f   :  { %1495 = vrot.lane.b32.xlu2 %v1494_v16, %s1609_s20 }
 0xc73   :  { %v1050_v1 = vpop.f32.mrf.mxu1 }
 0xc74   :  { %v1117_v49 = vpop.f32.mrf.mxu0 }
 0xc7b   :  { %v1052_v37 = vpop.f32.mrf.mxu1 }
 0xc7c   :  { %v1499_v21 = vpack.i.bf16 %v1052_v37, %v1050_v1  ;;  %v1119_v47 = vpop.f32.mrf.mxu0 }
 0xc7d   :  { %v1504_v43 = vpack.i.bf16 %v1119_v47, %v1117_v49 }
 0xc7e   :  { %1500 = vrot.lane.b32.xlu2 %v1499_v21, %s1608_s15 }
 0xc86   :  { %1505 = vrot.lane.b32.xlu2 %v1504_v43, %s1606_s13 }
 0xcb9   :  { %v1496_v54 = vpop.permute.xlu2 %1495 }
 0xcba   :  { %v1498_v14 = vunpack.i.h.bf16 %v1496_v54  ;;  %v1497_v5 = vunpack.i.l.bf16 %v1496_v54 }
 0xcbc   :  { %v1147_v56 = vsel %vm244_vm9, %v918_v3, %v1498_v14  ;;  %v1146_v57 = vsel %vm244_vm9, %v916_v41, %v1497_v5 }
 0xcd8   :  { %v1501_v59 = vpop.permute.xlu2 %1500 }
 0xcd9   :  { %v1503_v50 = vunpack.i.h.bf16 %v1501_v59  ;;  %v1502_v7 = vunpack.i.l.bf16 %v1501_v59 }
 0xcdb   :  { %v1148_v36 = vsel %vm67_vm0, %v1146_v57, %v1502_v7  ;;  %v1149_v20 = vsel %vm67_vm0, %v1147_v56, %v1503_v50 }
 0xce0   :  { %v1506_v52 = vpop.permute.xlu2 %1505 }
 0xce1   :  { %v1508_v28 = vunpack.i.h.bf16 %v1506_v52  ;;  %v1507_v33 = vunpack.i.l.bf16 %v1506_v52 }
 0xce3   :  { %v1151_v38 = vsel %vm538_vm10, %v1149_v20, %v1508_v28  ;;  %v1150_v34 = vsel %vm538_vm10, %v1148_v36, %v1507_v33 }
 0xce4   :  { %v1152_v46 = vpack.c.bf16 %v1151_v38, %v1150_v34 }
 0xce6   :  { %1446 = vmatmul.msk.bf16.vlgmr.msrb.gmra.mxu3 %vm203_vm8, %v1152_v46 }
 0xd69   :  { %v1165_v58 = vpop.f32.mrf.mxu3 }
 0xd6a   :  { %v1166_v44 = vadd.f32 %v1165_v58, %v1885_v25 }
 0xd6c   :  { %v1170_v23 = vadd.f32 %v1166_v44, %v2035_v2 }
 0xd6e   :  { %v1172_v39 = vsel %vm203_vm8, %v1170_v23, 0.0  ;;  %v1180_v60 = vmul.f32 %v1170_v23, %v1170_v23 }
 0xd6f   :  { %1173 = vadd.xlane.f32.xlu0 %v1172_v39 }
 0xd70   :  { %v1182_v8 = vsel %vm203_vm8, %v1180_v60, 0.0 }
 0xd71   :  { %v1167_v51 = vpop.f32.mrf.mxu3  ;;  %1183 = vadd.xlane.f32.xlu2 %v1182_v8 }
 0xd72   :  { %v1168_v61 = vadd.f32 %v1167_v51, %v1885_v25 }
 0xd74   :  { %v1171_v62 = vadd.f32 %v1168_v61, %v2038_v29 }
 0xd76   :  { %v1175_v15 = vsel %vm203_vm8, %v1171_v62, 0.0  ;;  %v1181_v63 = vmul.f32 %v1171_v62, %v1171_v62 }
 0xd77   :  { %1176 = vadd.xlane.f32.xlu1 %v1175_v15 }
 0xd78   :  { %v1185_v45 = vsel %vm203_vm8, %v1181_v63, 0.0 }
 0xd79   :  { %1186 = vadd.xlane.f32.xlu0 %v1185_v45 }
 0xde2   :  { %v1174_v2 = vpop.xlane.xlu0 %1173 }
 0xde3   :  { %v1178_v6 = vmul.f32 %v1174_v2, %v1920_v53 }
 0xde4   :  { %v1184_v9 = vpop.xlane.xlu2 %1183 }
 0xde5   :  { %v1190_v11 = vmul.f32 %v1178_v6, %v1178_v6  ;;  %v1188_v55 = vmul.f32 %v1184_v9, %v1920_v53  ;;  %v1194_v37 = vsub.f32 %v1170_v23, %v1178_v6 }
 0xde7   :  { %v1192_v12 = vsub.f32 %v1188_v55, %v1190_v11 }
 0xde9   :  { %v1196_v13 = vadd.f32 1e-12, %v1192_v12 }
 0xdea   :  { %v1177_v0 = vpop.xlane.xlu1 %1176 }
 0xdeb   :  { %1593 = vrsqrt.f32 %v1196_v13  ;;  %v1179_v25 = vmul.f32 %v1177_v0, %v1920_v53  ;;  %vm1204_vm9 = vweird.f32 %v1196_v13 }
 0xdec   :  { %v1187_v29 = vpop.xlane.xlu0 %1186 }
 0xded   :  { %v1191_v48 = vmul.f32 %v1179_v25, %v1179_v25  ;;  %v1189_v26 = vmul.f32 %v1187_v29, %v1920_v53  ;;  %v1195_v54 = vsub.f32 %v1171_v62, %v1179_v25 }
 0xdef   :  { %v1193_v27 = vsub.f32 %v1189_v26, %v1191_v48 }
 0xdf1   :  { %v1594_v17 = vpop.eup %1593  ;;  %v1197_v18 = vadd.f32 1e-12, %v1193_v27 }
 0xdf2   :  { %v1199_v19 = vmul.f32 %v1594_v17, %v1196_v13  ;;  %vm1205_vm0 = vweird.f32 %v1594_v17 }
 0xdf3   :  { %1595 = vrsqrt.f32 %v1197_v18  ;;  %vm1206_vm10 = vmor %vm1204_vm9, %vm1205_vm0  ;;  %vm1214_vm13 = vweird.f32 %v1197_v18 }
 0xdf4   :  { %v1200_v35 = vmul.f32 %v1594_v17, %v1199_v19 }
 0xdf6   :  { %v1201_v22 = vmul.f32 0.5, %v1200_v35 }
 0xdf8   :  { %v1202_v4 = vsub.f32 1.5, %v1201_v22 }
 0xdf9   :  { %v1596_v10 = vpop.eup %1595 }
 0xdfa   :  { %v1203_v16 = vmul.f32 %v1594_v17, %v1202_v4  ;;  %v1209_v41 = vmul.f32 %v1596_v10, %v1197_v18  ;;  %vm1215_vm12 = vweird.f32 %v1596_v10 }
 0xdfb   :  { %vm1216_vm14 = vmor %vm1214_vm13, %vm1215_vm12 }
 0xdfc   :  { %v1210_v3 = vmul.f32 %v1596_v10, %v1209_v41  ;;  %v1207_v1 = vsel %vm1206_vm10, %v1594_v17, %v1203_v16 }
 0xdfd   :  { %v1218_v47 = vmul.f32 %v1207_v1, %v1194_v37 }
 0xdfe   :  { %v1211_v49 = vmul.f32 0.5, %v1210_v3 }
 0xdff   :  { %v1220_v14 = vmul.f32 %v1218_v47, %v1949_v31 }
 0xe00   :  { %v1212_v21 = vsub.f32 1.5, %v1211_v49 }
 0xe01   :  { %v1222_v7 = vadd.f32 %v1220_v14, %v1954_v42 }
 0xe02   :  { %v1213_v43 = vmul.f32 %v1596_v10, %v1212_v21 }
 0xe04   :  { %v1217_v59 = vsel %vm1216_vm14, %v1596_v10, %v1213_v43 }
 0xe05   :  { %v1219_v5 = vmul.f32 %v1217_v59, %v1195_v54 }
 0xe07   :  { %v1221_v50 = vmul.f32 %v1219_v5, %v1949_v31 }
 0xe09   :  { %v1223_v52 = vadd.f32 %v1221_v50, %v1954_v42 }
 0xe0b   :  { %v1224_v56 = vpack.c.bf16 %v1223_v52, %v1222_v7 }
 0xe0d   :  { %1447 = vmatmul.msk.bf16.vlgmr.msra.gmra.mxu1 %vm203_vm8, %v1224_v56 }
 0xe8a   :  { %v1237_v57 = vpop.f32.mrf.mxu1 }
 0xe8b   :  { %v1238_v28 = vadd.f32 %v1237_v57, %v2008_v32 }
 0xe8d   :  { %v1244_v33 = vmul.f32 0.044715, %v1238_v28  ;;  %v1242_v61 = vmul.f32 0.5, %v1238_v28 }
 0xe8f   :  { %v1246_v36 = vmul.f32 %v1244_v33, %v1238_v28 }
 0xe91   :  { %v1248_v20 = vmul.f32 %v1246_v36, %v1238_v28 }
 0xe92   :  { %v1239_v38 = vpop.f32.mrf.mxu1 }
 0xe93   :  { %v1250_v34 = vadd.f32 %v1248_v20, %v1238_v28  ;;  %v1240_v46 = vadd.f32 %v1239_v38, %v2008_v32 }
 0xe95   :  { %v1245_v58 = vmul.f32 0.044715, %v1240_v46  ;;  %v1252_v44 = vmul.f32 0.7978846, %v1250_v34  ;;  %v1243_v62 = vmul.f32 0.5, %v1240_v46 }
 0xe97   :  { %v1247_v31 = vmul.f32 %v1245_v58, %v1240_v46  ;;  %1597 = vtanh.f32 %v1252_v44 }
 0xe99   :  { %v1249_v23 = vmul.f32 %v1247_v31, %v1240_v46 }
 0xe9b   :  { %v1251_v39 = vadd.f32 %v1249_v23, %v1240_v46 }
 0xe9d   :  { %v1253_v42 = vmul.f32 0.7978846, %v1251_v39  ;;  %v1598_v60 = vpop.eup %1597 }
 0xe9e   :  { %v1256_v8 = vadd.f32 1.0, %v1598_v60 }
 0xe9f   :  { %1599 = vtanh.f32 %v1253_v42 }
 0xea0   :  { %v1258_v63 = vmul.f32 %v1256_v8, %v1242_v61 }
 0xea5   :  { %v1600_v51 = vpop.eup %1599 }
 0xea6   :  { %v1257_v15 = vadd.f32 1.0, %v1600_v51 }
 0xea8   :  { %v1259_v45 = vmul.f32 %v1257_v15, %v1243_v62 }
 0xeaa   :  { %v1260_v2 = vpack.c.bf16 %v1259_v45, %v1258_v63 }
 0xeac   :  { %1269 = vmatmul.bf16.vlgmr.msra.gmra.mxu2 %v1260_v2 }
 0xf2f   :  { %v1270_v6 = vpop.f32.mrf.mxu2 }
 0xf30   :  { %v1271_v32 = vadd.f32 %v1270_v6, %v2016_v24 }
 0xf32   :  { %v1275_v9 = vadd.f32 %v1271_v32, %v1222_v7 }
 0xf34   :  { %v1277_v11 = vsel %vm203_vm8, %v1275_v9, 0.0  ;;  %v1285_v55 = vmul.f32 %v1275_v9, %v1275_v9 }
 0xf35   :  { %1278 = vadd.xlane.f32.xlu1 %v1277_v11 }
 0xf36   :  { %v1287_v12 = vsel %vm203_vm8, %v1285_v55, 0.0 }
 0xf37   :  { %v1272_v13 = vpop.f32.mrf.mxu2  ;;  %1288 = vadd.xlane.f32.xlu0 %v1287_v12 }
 0xf38   :  { %v1273_v0 = vadd.f32 %v1272_v13, %v2016_v24 }
 0xf3a   :  { %v1276_v25 = vadd.f32 %v1273_v0, %v1223_v52 }
 0xf3c   :  { %v1280_v29 = vsel %vm203_vm8, %v1276_v25, 0.0  ;;  %v1286_v48 = vmul.f32 %v1276_v25, %v1276_v25 }
 0xf3d   :  { %1281 = vadd.xlane.f32.xlu2 %v1280_v29 }
 0xf3e   :  { %v1290_v26 = vsel %vm203_vm8, %v1286_v48, 0.0 }
 0xf3f   :  { %1291 = vadd.xlane.f32.xlu1 %v1290_v26 }
 0xfa8   :  { %v1279_v27 = vpop.xlane.xlu1 %1278 }
 0xfa9   :  { %v1283_v17 = vmul.f32 %v1279_v27, %v1920_v53 }
 0xfaa   :  { %v1289_v18 = vpop.xlane.xlu0 %1288 }
 0xfab   :  { %v1295_v19 = vmul.f32 %v1283_v17, %v1283_v17  ;;  %v1293_v35 = vmul.f32 %v1289_v18, %v1920_v53  ;;  %v1299_v50 = vsub.f32 %v1275_v9, %v1283_v17 }
 0xfad   :  { %v1297_v22 = vsub.f32 %v1293_v35, %v1295_v19 }
 0xfaf   :  { %v1301_v4 = vadd.f32 1e-12, %v1297_v22 }
 0xfb0   :  { %v1282_v10 = vpop.xlane.xlu2 %1281 }
 0xfb1   :  { %1601 = vrsqrt.f32 %v1301_v4  ;;  %v1284_v24 = vmul.f32 %v1282_v10, %v1920_v53  ;;  %vm1309_vm1 = vweird.f32 %v1301_v4 }
 0xfb2   :  { %v1292_v16 = vpop.xlane.xlu1 %1291 }
 0xfb3   :  { %v1296_v41 = vmul.f32 %v1284_v24, %v1284_v24  ;;  %v1294_v3 = vmul.f32 %v1292_v16, %v1920_v53  ;;  %v1300_v20 = vsub.f32 %v1276_v25, %v1284_v24 }
 0xfb5   :  { %v1298_v1 = vsub.f32 %v1294_v3, %v1296_v41 }
 0xfb7   :  { %v1602_v49 = vpop.eup %1601  ;;  %v1302_v37 = vadd.f32 1e-12, %v1298_v1 }
 0xfb8   :  { %v1304_v21 = vmul.f32 %v1602_v49, %v1301_v4  ;;  %vm1310_vm15 = vweird.f32 %v1602_v49 }
 0xfb9   :  { %1603 = vrsqrt.f32 %v1302_v37  ;;  %vm1311_vm2 = vmor %vm1309_vm1, %vm1310_vm15  ;;  %vm1319_vm4 = vweird.f32 %v1302_v37 }
 0xfba   :  { %v1305_v47 = vmul.f32 %v1602_v49, %v1304_v21 }
 0xfbc   :  { %v1306_v43 = vmul.f32 0.5, %v1305_v47 }
 0xfbe   :  { %v1307_v54 = vsub.f32 1.5, %v1306_v43 }
 0xfbf   :  { %v1604_v59 = vpop.eup %1603 }
 0xfc0   :  { %v1308_v14 = vmul.f32 %v1602_v49, %v1307_v54  ;;  %v1314_v5 = vmul.f32 %v1604_v59, %v1302_v37  ;;  %vm1320_vm3 = vweird.f32 %v1604_v59 }
 0xfc1   :  { %vm1321_vm5 = vmor %vm1319_vm4, %vm1320_vm3 }
 0xfc2   :  { %v1312_v7 = vsel %vm1311_vm2, %v1602_v49, %v1308_v14  ;;  %v1315_v52 = vmul.f32 %v1604_v59, %v1314_v5 }
 0xfc3   :  { %v1323_v56 = vmul.f32 %v1312_v7, %v1299_v50 }
 0xfc4   :  { %v1316_v57 = vmul.f32 0.5, %v1315_v52 }
 0xfc5   :  { %v1325_v53 = vmul.f32 %v1323_v56, %v2028_v30 }
 0xfc6   :  { %v1317_v28 = vsub.f32 1.5, %v1316_v57 }
 0xfc7   :  { %v1327_v33 = vadd.f32 %v1325_v53, %v2030_v40 }
 0xfc8   :  { %v1318_v36 = vmul.f32 %v1604_v59, %v1317_v28 }
 0xfc9   :  { %1329 = vst.msk [vmem:[%s2177_s6] sm:$0xff] %vm203_vm8, %v1327_v33 }
 0xfca   :  { %v1322_v38 = vsel %vm1321_vm5, %v1604_v59, %v1318_v36 }
 0xfcb   :  { %v1324_v34 = vmul.f32 %v1322_v38, %v1300_v20 }
 0xfcd   :  { %v1326_v46 = vmul.f32 %v1324_v34, %v2028_v30 }
 0xfcf   :  { %v1328_v58 = vadd.f32 %v1326_v46, %v2030_v40 }
 0xfd1   :  { %1330 = vst.msk [vmem:[%s2177_s6 + $0x8] sm:$0xff] %vm203_vm8, %v1328_v58 }

</bundles_post_ra>
